<compile_context>
chip_gen: v7x
topology: tpu7x:2x2x1
jax: 0.10.0
libtpu: 0.0.40
codegen_flags: <defaults>
</compile_context>

<pallas_src>
import jax
import jax.numpy as jnp
from jax import lax
from jax.experimental import pallas as pl
from jax.experimental.pallas import tpu as pltpu


def _round_up(x, m):
    return ((x + m - 1) // m) * m


def _vmem_estimate_bytes(Bt, H, Hp, N_pad, cd_bytes):
    """Crude per-grid-step VMEM footprint (double-buffered inputs/outputs plus the
    big f32 intermediates) used to size the batch tile and the VMEM limit."""
    M = Bt * N_pad
    slab = 2 * 2 * H * M * cd_bytes            # static + dynamic slabs, double-buffered
    e_mat = 2 * Bt * M * cd_bytes              # segment matrix E (constant index, still x2)
    small_in = 2 * (M * 4 + Bt * 2 * Hp * 4)   # node mask + [x | h_prev]
    inter = 3 * H * M * 4 + 8 * M * 4          # u, t, ea + (1, M) attention rows (f32)
    outs = 2 * (M * 4 + Bt * Hp * 4)           # probs + new hidden, double-buffered
    weights = (2 * Hp * 4 * Hp + 4 * Hp + 4 * H * H + H * Hp + 2 * H) * 4
    return slab + e_mat + small_in + inter + outs + weights


def pointer_forward(static_hidden, dynamic_hidden, decoder_hidden, last_hh, params,
                    *, batch_tile=None, compute_dtype=jnp.bfloat16,
                    vmem_limit_bytes=None, slab_buffers=None):
    """static/dynamic: (B,H,N); decoder_hidden: (B,H,1); last_hh: (1,B,H).

    Returns (probs (B,N), new last_hh (1,B,H)).

    compute_dtype (default bf16) is used only as MXU-operand dtype for the big
    encoder slabs / their weights / E; accumulation and elementwise math are f32.
    """
    B, H, N = static_hidden.shape
    f32 = jnp.float32
    cdt = compute_dtype
    cd_bytes = jnp.dtype(cdt).itemsize

    N_pad = _round_up(N, 128)          # lane-dense node axis
    Hp = _round_up(H, 128)             # lane-dense hidden axis for the GRU path

    # ---- VMEM-aware batch-tile selection (v7x: 64 MiB physical, 32 MiB default scoped) ----
    try:
        phys_vmem = int(getattr(pltpu.get_tpu_info(), "vmem_capacity_bytes", 64 << 20))
    except Exception:
        phys_vmem = 64 << 20
    budget = max(24 << 20, int(phys_vmem * 0.6))

    if batch_tile is None:
        Bt = 1
        # NOTE(v7x): prefer a Bt that leaves T = ceil(B/Bt) >= 2 (and even) so both
        # TensorCores get balanced work under dimension_semantics=("parallel",).
        for cand in (64, 32, 16, 8, 4, 2):
            if cand <= B and _vmem_estimate_bytes(cand, H, Hp, N_pad, cd_bytes) <= budget:
                Bt = cand
                break
    else:
        Bt = max(1, min(int(batch_tile), B))

    B_pad = _round_up(B, Bt)
    T = B_pad // Bt
    M = Bt * N_pad                     # folded (batch-in-tile, node) lane axis

    if vmem_limit_bytes is None:
        vmem_limit_bytes = int(min(phys_vmem * 0.85,
                                   max(32 << 20,
                                       2 * _vmem_estimate_bytes(Bt, H, Hp, N_pad, cd_bytes))))

    # ---------------- encoder slabs: cast FIRST, then pad/fold ----------------
    # Layout (T, H, Bt*N_pad): columns ordered (batch-in-tile, node), node fastest.
    # TODO(synk): have the encoder emit this folded layout directly so the
    # transpose pass below disappears from the HBM budget entirely.
    def prep(a):
        a = a.astype(cdt)
        a = jnp.pad(a, ((0, B_pad - B), (0, 0), (0, N_pad - N)))
        return a.reshape(T, Bt, H, N_pad).transpose(0, 2, 1, 3).reshape(T, H, M)

    s_slab = prep(static_hidden)
    d_slab = prep(dynamic_hidden)

    # ---------------- GRU input: [x | h_prev], hidden padded to Hp ----------------
    x = decoder_hidden[:, :, 0].astype(f32)        # (B, H)
    h_prev = last_hh[0].astype(f32)                # (B, H)

    def pad_bh(a):
        return jnp.pad(a, ((0, B_pad - B), (0, Hp - H)))

    xh = jnp.concatenate([pad_bh(x), pad_bh(h_prev)], axis=1).reshape(T, Bt, 2 * Hp)

    # ---------------- fused single-step GRU weights ----------------
    # g = [x | h] @ W + b with column blocks [r | z | n_x | n_h] (each Hp wide):
    #   r,z combine input+hidden contributions; n_x = W_in x + b_in; n_h = W_hn h + b_hn.
    w_ih = params["w_ih"].astype(f32)              # (3H, H), gate order [r; z; n]
    w_hh = params["w_hh"].astype(f32)
    b_ih = params["b_ih"].astype(f32)
    b_hh = params["b_hh"].astype(f32)

    def gate_T(w, g):                              # gate g of w, transposed, padded to (Hp, Hp)
        return jnp.pad(w[g * H:(g + 1) * H].T, ((0, Hp - H), (0, Hp - H)))

    def gate_b(b, g):                              # gate g of bias, padded to (Hp,)
        return jnp.pad(b[g * H:(g + 1) * H], (0, Hp - H))

    zHH = jnp.zeros((Hp, Hp), f32)
    w_gru = jnp.concatenate([
        jnp.concatenate([gate_T(w_ih, 0), gate_T(w_ih, 1), gate_T(w_ih, 2), zHH], axis=1),
        jnp.concatenate([gate_T(w_hh, 0), gate_T(w_hh, 1), zHH, gate_T(w_hh, 2)], axis=1),
    ], axis=0)                                                     # (2Hp, 4Hp)
    b_gru = jnp.concatenate([gate_b(b_ih, 0) + gate_b(b_hh, 0),
                             gate_b(b_ih, 1) + gate_b(b_hh, 1),
                             gate_b(b_ih, 2),
                             gate_b(b_hh, 2)]).reshape(1, 4 * Hp)

    # ---------------- attention / pointer weights (split, no in-kernel concat) ----------------
    wa = params["wa"].astype(f32)                   # (H, 3H) = [Wa_s | Wa_d | Wa_h]
    wa_s = wa[:, 0:H].astype(cdt)
    wa_d = wa[:, H:2 * H].astype(cdt)
    wa_h = jnp.pad(wa[:, 2 * H:3 * H], ((0, 0), (0, Hp - H)))      # (H, Hp) f32
    va = params["va"].reshape(H, 1).astype(f32)
    wp = params["wp"].astype(f32)                   # (H, 2H) = [Wp_s | Wp_c]
    wp_s = wp[:, 0:H].astype(cdt)
    wp_c = wp[:, H:2 * H]                           # (H, H) f32 (tiny matmul)
    vp = params["vp"].reshape(H, 1).astype(f32)

    # ---------------- node-pad mask + segment (block-broadcast) matrix ----------------
    cols = jnp.arange(M, dtype=jnp.int32)
    mask = jnp.where((cols % N_pad) < N, 0.0, -1e30).astype(f32).reshape(1, M)
    E = ((cols[None, :] // N_pad) ==
         jnp.arange(Bt, dtype=jnp.int32)[:, None]).astype(cdt)     # (Bt, M), 0/1 exact in bf16

    # ---------------- kernel ----------------
    def kernel(s_ref, d_ref, xh_ref, mask_ref, e_ref,
               w_gru_ref, b_gru_ref,
               wa_s_ref, wa_d_ref, wa_h_ref, va_ref,
               wp_s_ref, wp_c_ref, vp_ref,
               probs_ref, hh_ref):
        Emat = e_ref[...]                            # (Bt, M) compute dtype
        node_mask = mask_ref[...]                    # (1, M)  f32

        # ---- fused single-step GRU (one matmul, K = 2*Hp) ----
        xh_v = xh_ref[0]                             # (Bt, 2Hp) f32
        hprev = xh_v[:, Hp:]
        g = jnp.dot(xh_v, w_gru_ref[...], preferred_element_type=f32) + b_gru_ref[...]
        r = jax.nn.sigmoid(g[:, 0:Hp])
        z = jax.nn.sigmoid(g[:, Hp:2 * Hp])
        n = jnp.tanh(g[:, 2 * Hp:3 * Hp] + r * g[:, 3 * Hp:4 * Hp])
        h = (1.0 - z) * n + z * hprev                # (Bt, Hp); padded lanes stay exactly 0
        hh_ref[...] = h[None].astype(hh_ref.dtype)   # lane-dense (Hp % 128 == 0) store
        # drop_rnn / drop_hh: identity in inference mode.

        # ---- encoder attention ----
        s = s_ref[0]                                 # (H, M) static slab (compute dtype)
        d = d_ref[0]                                 # (H, M) dynamic slab
        hid_c = lax.dot_general(wa_h_ref[...], h, (((1,), (1,)), ((), ())),
                                preferred_element_type=f32)                 # (H, Bt)
        u = jnp.tanh(jnp.dot(wa_s_ref[...], s, preferred_element_type=f32)
                     + jnp.dot(wa_d_ref[...], d, preferred_element_type=f32)
                     + jnp.dot(hid_c.astype(Emat.dtype), Emat,
                               preferred_element_type=f32))                 # (H, M) f32
        logits = jnp.sum(va_ref[...] * u, axis=0, keepdims=True) + node_mask  # (1, M)
        # Single global max is a valid softmax shift (|logits| <= ||va||_1 since |u| <= 1).
        m_max = jnp.max(logits, axis=1, keepdims=True)
        expv = jnp.exp(logits - m_max)                                      # padded cols -> 0
        seg_sum = lax.dot_general(expv.astype(Emat.dtype), Emat, (((1,), (1,)), ((), ())),
                                  preferred_element_type=f32)               # (1, Bt)
        inv_seg = pl.reciprocal(seg_sum, approx=True)                       # Bt reciprocals only
        attn = expv * jnp.dot(inv_seg.astype(Emat.dtype), Emat,
                              preferred_element_type=f32)                   # (1, M) per-batch softmax

        # ---- context + pointer scores ----
        ea = Emat * attn.astype(Emat.dtype)                                 # (Bt, M)
        ctx = lax.dot_general(s, ea, (((1,), (1,)), ((), ())),
                              preferred_element_type=f32)                   # (H, Bt)
        ctx_c = jnp.dot(wp_c_ref[...], ctx, preferred_element_type=f32)     # (H, Bt)
        t = jnp.tanh(jnp.dot(wp_s_ref[...], s, preferred_element_type=f32)
                     + jnp.dot(ctx_c.astype(Emat.dtype), Emat,
                               preferred_element_type=f32))                 # (H, M)
        probs = jnp.sum(vp_ref[...] * t, axis=0, keepdims=True)             # (1, M)
        probs_ref[...] = probs[None].astype(probs_ref.dtype)

    def const_spec(shape):
        return pl.BlockSpec(shape, lambda i, _n=len(shape): (0,) * _n)

    slab_kwargs = {}
    if slab_buffers is not None and int(slab_buffers) != 2:
        # v5e/v6e: a 3rd buffer can smooth HBM burstiness; keep 2 on v7x (64 MiB VMEM).
        slab_kwargs["pipeline_mode"] = pl.Buffered(int(slab_buffers))
    slab_spec = pl.BlockSpec((1, H, M), lambda i: (i, 0, 0), **slab_kwargs)

    # TODO(synk): for very large N on v7x, add a node-tile grid axis with an online
    # segmented softmax so u/t intermediates stop scaling with N.
    probs3, hh3 = pl.pallas_call(
        kernel,
        out_shape=(jax.ShapeDtypeStruct((T, 1, M), f32),
                   jax.ShapeDtypeStruct((T, Bt, Hp), f32)),
        grid_spec=pltpu.PrefetchScalarGridSpec(
            num_scalar_prefetch=0,
            grid=(T,),
            in_specs=[
                slab_spec,                                        # static slab
                slab_spec,                                        # dynamic slab
                pl.BlockSpec((1, Bt, 2 * Hp), lambda i: (i, 0, 0)),  # [x | h_prev]
                const_spec((1, M)),                               # node pad mask
                const_spec((Bt, M)),                              # segment matrix E
                const_spec((2 * Hp, 4 * Hp)),                     # fused GRU weight
                const_spec((1, 4 * Hp)),                          # fused GRU bias
                const_spec((H, H)),                               # Wa_static
                const_spec((H, H)),                               # Wa_dynamic
                const_spec((H, Hp)),                              # Wa_hidden
                const_spec((H, 1)),                               # va
                const_spec((H, H)),                               # Wp_static
                const_spec((H, H)),                               # Wp_context
                const_spec((H, 1)),                               # vp
            ],
            out_specs=(pl.BlockSpec((1, 1, M), lambda i: (i, 0, 0)),
                       pl.BlockSpec((1, Bt, Hp), lambda i: (i, 0, 0))),
        ),
        compiler_params=pltpu.CompilerParams(
            dimension_semantics=("parallel",),        # batch-tile axis, shardable across v7x TCs
            vmem_limit_bytes=vmem_limit_bytes),
    )(s_slab, d_slab, xh, mask, E, w_gru, b_gru,
      wa_s, wa_d, wa_h, va, wp_s, wp_c, vp)

    probs = probs3.reshape(B_pad, N_pad)[:B, :N]
    new_hh = hh3.reshape(B_pad, Hp)[:B, :H][None]
    return probs.astype(static_hidden.dtype), new_hh.astype(last_hh.dtype)


def pointer_reference(static, dynamic, dec, last_hh, p):
    """Pure-JAX reference mirroring the PyTorch forward (eval mode)."""
    B, H, N = static.shape
    x = jnp.transpose(dec, (0, 2, 1))[:, 0, :]                # (B, H)
    h0 = last_hh[0]                                           # (B, H)
    gi = x @ p["w_ih"].T + p["b_ih"]
    gh = h0 @ p["w_hh"].T + p["b_hh"]
    r = jax.nn.sigmoid(gi[:, :H] + gh[:, :H])
    z = jax.nn.sigmoid(gi[:, H:2 * H] + gh[:, H:2 * H])
    n = jnp.tanh(gi[:, 2 * H:] + r * gh[:, 2 * H:])
    h = (1.0 - z) * n + z * h0                                # (B, H)
    hid = jnp.broadcast_to(h[:, :, None], (B, H, N))
    cat3 = jnp.concatenate([static, dynamic, hid], axis=1)    # (B, 3H, N)
    u = jnp.tanh(jnp.einsum('hk,bkn->bhn', p["wa"], cat3))
    logits = jnp.einsum('h,bhn->bn', p["va"], u)
    attn = jax.nn.softmax(logits, axis=-1)                    # (B, N)
    context = jnp.einsum('bn,bhn->bh', attn, static)
    ctx = jnp.broadcast_to(context[:, :, None], (B, H, N))
    energy = jnp.concatenate([static, ctx], axis=1)           # (B, 2H, N)
    t = jnp.tanh(jnp.einsum('hk,bkn->bhn', p["wp"], energy))
    probs = jnp.einsum('h,bhn->bn', p["vp"], t)
    return probs, h[None]


def init_params(key, H):
    ks = jax.random.split(key, 8)
    s = 1.0 / jnp.sqrt(H)
    u = lambda k, shape: jax.random.uniform(k, shape, jnp.float32, -s, s)
    # NOTE: the PyTorch module initializes W / v to zeros; small deterministic
    # random values are used here so the kernel's hot path is exercised.
    return {
        "w_ih": u(ks[0], (3 * H, H)),
        "w_hh": u(ks[1], (3 * H, H)),
        "b_ih": u(ks[2], (3 * H,)),
        "b_hh": u(ks[3], (3 * H,)),
        "wa":   u(ks[4], (H, 3 * H)),   # Attention.W (squeezed from (1, H, 3H))
        "va":   u(ks[5], (H,)),         # Attention.v (squeezed from (1, 1, H))
        "wp":   u(ks[6], (H, 2 * H)),   # Pointer.W   (squeezed from (1, H, 2H))
        "vp":   u(ks[7], (H,)),         # Pointer.v   (squeezed from (1, 1, H))
    }


if __name__ == "__main__":
    B, H, N = 2, 32, 8
    key = jax.random.PRNGKey(0)
    k_s, k_d, k_dec, k_hh, k_p = jax.random.split(key, 5)

    static_hidden = jax.random.normal(k_s, (B, H, N), jnp.float32)
    dynamic_hidden = jax.random.normal(k_d, (B, H, N), jnp.float32)
    decoder_hidden = jax.random.normal(k_dec, (B, H, 1), jnp.float32)
    last_hh = jax.random.normal(k_hh, (1, B, H), jnp.float32)
    params = init_params(k_p, H)

    probs_ref, hh_ref = pointer_reference(static_hidden, dynamic_hidden,
                                          decoder_hidden, last_hh, params)

    # Default path: bf16 MXU operands for the encoder slab (memory-bound kernel).
    probs_bf, hh_bf = pointer_forward(static_hidden, dynamic_hidden,
                                      decoder_hidden, last_hh, params)
    jax.block_until_ready((probs_bf, hh_bf))
    assert probs_bf.shape == (B, N) and hh_bf.shape == (1, B, H)
    assert bool(jnp.allclose(hh_bf, hh_ref, atol=5e-3, rtol=5e-3))
    assert bool(jnp.allclose(probs_bf, probs_ref, atol=1e-1, rtol=1e-1))

    # f32 path (tight tolerance; only the approx softmax reciprocal / matmul
    # accumulation order differ from the pure-JAX reference).
    probs_f32, hh_f32 = pointer_forward(static_hidden, dynamic_hidden,
                                        decoder_hidden, last_hh, params,
                                        compute_dtype=jnp.float32)
    jax.block_until_ready((probs_f32, hh_f32))
    assert bool(jnp.allclose(probs_f32, probs_ref, atol=2e-2, rtol=2e-2))
    assert bool(jnp.allclose(hh_f32, hh_ref, atol=5e-3, rtol=5e-3))

    print("KERNEL_OK")
</pallas_src>

<mosaic_0001>
module attributes {stable_mosaic.version = 11 : i64} {
  func.func @kernel(%arg0: i32, %arg1: memref<1x32x256xbf16, #tpu.memory_space<vmem>>, %arg2: memref<1x32x256xbf16, #tpu.memory_space<vmem>>, %arg3: memref<1x2x256xf32, #tpu.memory_space<vmem>>, %arg4: memref<1x256xf32, #tpu.memory_space<vmem>>, %arg5: memref<2x256xbf16, #tpu.memory_space<vmem>>, %arg6: memref<256x512xf32, #tpu.memory_space<vmem>>, %arg7: memref<1x512xf32, #tpu.memory_space<vmem>>, %arg8: memref<32x32xbf16, #tpu.memory_space<vmem>>, %arg9: memref<32x32xbf16, #tpu.memory_space<vmem>>, %arg10: memref<32x128xf32, #tpu.memory_space<vmem>>, %arg11: memref<32x1xf32, #tpu.memory_space<vmem>>, %arg12: memref<32x32xbf16, #tpu.memory_space<vmem>>, %arg13: memref<32x32xf32, #tpu.memory_space<vmem>>, %arg14: memref<32x1xf32, #tpu.memory_space<vmem>>, %arg15: memref<1x1x256xf32, #tpu.memory_space<vmem>>, %arg16: memref<1x2x128xf32, #tpu.memory_space<vmem>>) attributes {dimension_semantics = [#tpu.dimension_semantics<parallel>], iteration_bounds = array<i64: 1>, scalar_prefetch = 0 : i64, scratch_operands = 0 : i64, tpu.core_type = #tpu.core_type<tc>, window_params = [{transform_indices = @transform_0, window_bounds = array<i64: 1, 32, 256>}, {transform_indices = @transform_1, window_bounds = array<i64: 1, 32, 256>}, {transform_indices = @transform_2, window_bounds = array<i64: 1, 2, 256>}, {pipeline_mode = #tpu.pipeline_mode<synchronous>, transform_indices = @transform_3, window_bounds = array<i64: 1, 256>}, {pipeline_mode = #tpu.pipeline_mode<synchronous>, transform_indices = @transform_4, window_bounds = array<i64: 2, 256>}, {pipeline_mode = #tpu.pipeline_mode<synchronous>, transform_indices = @transform_5, window_bounds = array<i64: 256, 512>}, {pipeline_mode = #tpu.pipeline_mode<synchronous>, transform_indices = @transform_6, window_bounds = array<i64: 1, 512>}, {pipeline_mode = #tpu.pipeline_mode<synchronous>, transform_indices = @transform_7, window_bounds = array<i64: 32, 32>}, {pipeline_mode = #tpu.pipeline_mode<synchronous>, transform_indices = @transform_8, window_bounds = array<i64: 32, 32>}, {pipeline_mode = #tpu.pipeline_mode<synchronous>, transform_indices = @transform_9, window_bounds = array<i64: 32, 128>}, {pipeline_mode = #tpu.pipeline_mode<synchronous>, transform_indices = @transform_10, window_bounds = array<i64: 32, 1>}, {pipeline_mode = #tpu.pipeline_mode<synchronous>, transform_indices = @transform_11, window_bounds = array<i64: 32, 32>}, {pipeline_mode = #tpu.pipeline_mode<synchronous>, transform_indices = @transform_12, window_bounds = array<i64: 32, 32>}, {pipeline_mode = #tpu.pipeline_mode<synchronous>, transform_indices = @transform_13, window_bounds = array<i64: 32, 1>}, {transform_indices = @transform_14, window_bounds = array<i64: 1, 1, 256>}, {transform_indices = @transform_15, window_bounds = array<i64: 1, 2, 128>}]} {
    %c0 = arith.constant 0 : index
    %c0_0 = arith.constant 0 : index
    %0 = vector.load %arg5[%c0, %c0_0] : memref<2x256xbf16, #tpu.memory_space<vmem>>, vector<2x256xbf16>
    %c0_1 = arith.constant 0 : index
    %c0_2 = arith.constant 0 : index
    %1 = vector.load %arg4[%c0_1, %c0_2] : memref<1x256xf32, #tpu.memory_space<vmem>>, vector<1x256xf32>
    %c0_3 = arith.constant 0 : index
    %c0_4 = arith.constant 0 : index
    %c0_5 = arith.constant 0 : index
    %2 = vector.load %arg3[%c0_3, %c0_4, %c0_5] : memref<1x2x256xf32, #tpu.memory_space<vmem>>, vector<1x2x256xf32>
    %3 = vector.shape_cast %2 : vector<1x2x256xf32> to vector<2x256xf32>
    %4 = vector.extract_strided_slice %3 {offsets = [0, 128], sizes = [2, 128], strides = [1, 1]} : vector<2x256xf32> to vector<2x128xf32>
    %c0_6 = arith.constant 0 : index
    %c0_7 = arith.constant 0 : index
    %5 = vector.load %arg6[%c0_6, %c0_7] : memref<256x512xf32, #tpu.memory_space<vmem>>, vector<256x512xf32>
    %cst = arith.constant dense<0.000000e+00> : vector<2x512xf32>
    %6 = tpu.matmul %3, %5, %cst {dimension_numbers = #tpu.dot_dimension_numbers<[1], [0], [0], [1], [0, 0, 1, 1], [], []>} : vector<2x256xf32>, vector<256x512xf32>, vector<2x512xf32> -> vector<2x512xf32>
    %c0_8 = arith.constant 0 : index
    %c0_9 = arith.constant 0 : index
    %7 = vector.load %arg7[%c0_8, %c0_9] : memref<1x512xf32, #tpu.memory_space<vmem>>, vector<1x512xf32>
    %8 = vector.broadcast %7 : vector<1x512xf32> to vector<2x512xf32>
    %9 = arith.addf %6, %8 : vector<2x512xf32>
    %10 = vector.extract_strided_slice %9 {offsets = [0, 0], sizes = [2, 128], strides = [1, 1]} : vector<2x512xf32> to vector<2x128xf32>
    %11 = arith.negf %10 : vector<2x128xf32>
    %12 = math.exp %11 : vector<2x128xf32>
    %cst_10 = arith.constant 1.000000e+00 : f32
    %13 = vector.broadcast %cst_10 : f32 to vector<2x128xf32>
    %14 = arith.addf %13, %12 : vector<2x128xf32>
    %15 = arith.divf %13, %14 : vector<2x128xf32>
    %16 = vector.extract_strided_slice %9 {offsets = [0, 128], sizes = [2, 128], strides = [1, 1]} : vector<2x512xf32> to vector<2x128xf32>
    %17 = arith.negf %16 : vector<2x128xf32>
    %18 = math.exp %17 : vector<2x128xf32>
    %cst_11 = arith.constant 1.000000e+00 : f32
    %19 = vector.broadcast %cst_11 : f32 to vector<2x128xf32>
    %20 = arith.addf %19, %18 : vector<2x128xf32>
    %21 = arith.divf %19, %20 : vector<2x128xf32>
    %22 = vector.extract_strided_slice %9 {offsets = [0, 256], sizes = [2, 128], strides = [1, 1]} : vector<2x512xf32> to vector<2x128xf32>
    %23 = vector.extract_strided_slice %9 {offsets = [0, 384], sizes = [2, 128], strides = [1, 1]} : vector<2x512xf32> to vector<2x128xf32>
    %24 = arith.mulf %15, %23 : vector<2x128xf32>
    %25 = arith.addf %22, %24 : vector<2x128xf32>
    %26 = math.tanh %25 : vector<2x128xf32>
    %cst_12 = arith.constant 1.000000e+00 : f32
    %27 = vector.broadcast %cst_12 : f32 to vector<2x128xf32>
    %28 = arith.subf %27, %21 : vector<2x128xf32>
    %29 = arith.mulf %28, %26 : vector<2x128xf32>
    %30 = arith.mulf %21, %4 : vector<2x128xf32>
    %31 = arith.addf %29, %30 : vector<2x128xf32>
    %32 = vector.shape_cast %31 : vector<2x128xf32> to vector<1x2x128xf32>
    %c0_13 = arith.constant 0 : index
    %c0_14 = arith.constant 0 : index
    %c0_15 = arith.constant 0 : index
    %33 = vector.load %arg16[%c0_13, %c0_14, %c0_15] : memref<1x2x128xf32, #tpu.memory_space<vmem>>, vector<1x2x128xf32>
    tpu.vector_store %arg16[%c0_13, %c0_14, %c0_15], %32 {strides = array<i32>} : memref<1x2x128xf32, #tpu.memory_space<vmem>>, vector<1x2x128xf32>,
    %c0_16 = arith.constant 0 : index
    %c0_17 = arith.constant 0 : index
    %c0_18 = arith.constant 0 : index
    %34 = vector.load %arg1[%c0_16, %c0_17, %c0_18] : memref<1x32x256xbf16, #tpu.memory_space<vmem>>, vector<1x32x256xbf16>
    %35 = vector.shape_cast %34 : vector<1x32x256xbf16> to vector<32x256xbf16>
    %c0_19 = arith.constant 0 : index
    %c0_20 = arith.constant 0 : index
    %c0_21 = arith.constant 0 : index
    %36 = vector.load %arg2[%c0_19, %c0_20, %c0_21] : memref<1x32x256xbf16, #tpu.memory_space<vmem>>, vector<1x32x256xbf16>
    %37 = vector.shape_cast %36 : vector<1x32x256xbf16> to vector<32x256xbf16>
    %c0_22 = arith.constant 0 : index
    %c0_23 = arith.constant 0 : index
    %38 = vector.load %arg10[%c0_22, %c0_23] : memref<32x128xf32, #tpu.memory_space<vmem>>, vector<32x128xf32>
    %cst_24 = arith.constant dense<0.000000e+00> : vector<32x2xf32>
    %39 = tpu.matmul %38, %31, %cst_24 {dimension_numbers = #tpu.dot_dimension_numbers<[1], [1], [0], [0], [0, 0, 1, 0], [], []>} : vector<32x128xf32>, vector<2x128xf32>, vector<32x2xf32> -> vector<32x2xf32>
    %c0_25 = arith.constant 0 : index
    %c0_26 = arith.constant 0 : index
    %40 = vector.load %arg8[%c0_25, %c0_26] : memref<32x32xbf16, #tpu.memory_space<vmem>>, vector<32x32xbf16>
    %cst_27 = arith.constant dense<0.000000e+00> : vector<32x256xf32>
    %41 = tpu.matmul %40, %35, %cst_27 {dimension_numbers = #tpu.dot_dimension_numbers<[1], [0], [0], [1], [0, 0, 1, 1], [], []>} : vector<32x32xbf16>, vector<32x256xbf16>, vector<32x256xf32> -> vector<32x256xf32>
    %c0_28 = arith.constant 0 : index
    %c0_29 = arith.constant 0 : index
    %42 = vector.load %arg9[%c0_28, %c0_29] : memref<32x32xbf16, #tpu.memory_space<vmem>>, vector<32x32xbf16>
    %cst_30 = arith.constant dense<0.000000e+00> : vector<32x256xf32>
    %43 = tpu.matmul %42, %37, %cst_30 {dimension_numbers = #tpu.dot_dimension_numbers<[1], [0], [0], [1], [0, 0, 1, 1], [], []>} : vector<32x32xbf16>, vector<32x256xbf16>, vector<32x256xf32> -> vector<32x256xf32>
    %44 = arith.addf %41, %43 : vector<32x256xf32>
    %45 = arith.truncf %39 : vector<32x2xf32> to vector<32x2xbf16>
    %cst_31 = arith.constant dense<0.000000e+00> : vector<32x256xf32>
    %46 = tpu.matmul %45, %0, %cst_31 {dimension_numbers = #tpu.dot_dimension_numbers<[1], [0], [0], [1], [0, 0, 1, 1], [], []>} : vector<32x2xbf16>, vector<2x256xbf16>, vector<32x256xf32> -> vector<32x256xf32>
    %47 = arith.addf %44, %46 : vector<32x256xf32>
    %48 = math.tanh %47 : vector<32x256xf32>
    %c0_32 = arith.constant 0 : index
    %c0_33 = arith.constant 0 : index
    %49 = vector.load %arg11[%c0_32, %c0_33] : memref<32x1xf32, #tpu.memory_space<vmem>>, vector<32x1xf32>
    %50 = vector.broadcast %49 : vector<32x1xf32> to vector<32x256xf32>
    %51 = arith.mulf %50, %48 : vector<32x256xf32>
    %cst_34 = arith.constant dense<0.000000e+00> : vector<256xf32>
    %52 = vector.multi_reduction <add>, %51, %cst_34 [0] : vector<32x256xf32> to vector<256xf32>
    %53 = vector.shape_cast %52 : vector<256xf32> to vector<1x256xf32>
    %54 = arith.addf %53, %1 : vector<1x256xf32>
    %cst_35 = arith.constant dense<0xFF800000> : vector<1xf32>
    %55 = vector.multi_reduction <maximumf>, %54, %cst_35 [1] : vector<1x256xf32> to vector<1xf32>
    %56 = vector.shape_cast %55 : vector<1xf32> to vector<1x1xf32>
    %57 = vector.broadcast %56 : vector<1x1xf32> to vector<1x256xf32>
    %58 = arith.subf %54, %57 : vector<1x256xf32>
    %59 = math.exp %58 : vector<1x256xf32>
    %60 = arith.truncf %59 : vector<1x256xf32> to vector<1x256xbf16>
    %cst_36 = arith.constant dense<0.000000e+00> : vector<1x2xf32>
    %61 = tpu.matmul %60, %0, %cst_36 {dimension_numbers = #tpu.dot_dimension_numbers<[1], [1], [0], [0], [0, 0, 1, 0], [], []>} : vector<1x256xbf16>, vector<2x256xbf16>, vector<1x2xf32> -> vector<1x2xf32>
    %62 = tpu.reciprocal %61 {approx = true} : vector<1x2xf32> -> vector<1x2xf32>
    %63 = arith.truncf %62 : vector<1x2xf32> to vector<1x2xbf16>
    %cst_37 = arith.constant dense<0.000000e+00> : vector<1x256xf32>
    %64 = tpu.matmul %63, %0, %cst_37 {dimension_numbers = #tpu.dot_dimension_numbers<[1], [0], [0], [1], [0, 0, 1, 1], [], []>} : vector<1x2xbf16>, vector<2x256xbf16>, vector<1x256xf32> -> vector<1x256xf32>
    %65 = arith.mulf %59, %64 : vector<1x256xf32>
    %66 = arith.truncf %65 : vector<1x256xf32> to vector<1x256xbf16>
    %67 = vector.broadcast %66 : vector<1x256xbf16> to vector<2x256xbf16>
    %68 = arith.mulf %0, %67 : vector<2x256xbf16>
    %cst_38 = arith.constant dense<0.000000e+00> : vector<32x2xf32>
    %69 = tpu.matmul %35, %68, %cst_38 {dimension_numbers = #tpu.dot_dimension_numbers<[1], [1], [0], [0], [0, 0, 1, 0], [], []>} : vector<32x256xbf16>, vector<2x256xbf16>, vector<32x2xf32> -> vector<32x2xf32>
    %c0_39 = arith.constant 0 : index
    %c0_40 = arith.constant 0 : index
    %70 = vector.load %arg13[%c0_39, %c0_40] : memref<32x32xf32, #tpu.memory_space<vmem>>, vector<32x32xf32>
    %cst_41 = arith.constant dense<0.000000e+00> : vector<32x2xf32>
    %71 = tpu.matmul %70, %69, %cst_41 {dimension_numbers = #tpu.dot_dimension_numbers<[1], [0], [0], [1], [0, 0, 1, 1], [], []>} : vector<32x32xf32>, vector<32x2xf32>, vector<32x2xf32> -> vector<32x2xf32>
    %c0_42 = arith.constant 0 : index
    %c0_43 = arith.constant 0 : index
    %72 = vector.load %arg12[%c0_42, %c0_43] : memref<32x32xbf16, #tpu.memory_space<vmem>>, vector<32x32xbf16>
    %cst_44 = arith.constant dense<0.000000e+00> : vector<32x256xf32>
    %73 = tpu.matmul %72, %35, %cst_44 {dimension_numbers = #tpu.dot_dimension_numbers<[1], [0], [0], [1], [0, 0, 1, 1], [], []>} : vector<32x32xbf16>, vector<32x256xbf16>, vector<32x256xf32> -> vector<32x256xf32>
    %74 = arith.truncf %71 : vector<32x2xf32> to vector<32x2xbf16>
    %cst_45 = arith.constant dense<0.000000e+00> : vector<32x256xf32>
    %75 = tpu.matmul %74, %0, %cst_45 {dimension_numbers = #tpu.dot_dimension_numbers<[1], [0], [0], [1], [0, 0, 1, 1], [], []>} : vector<32x2xbf16>, vector<2x256xbf16>, vector<32x256xf32> -> vector<32x256xf32>
    %76 = arith.addf %73, %75 : vector<32x256xf32>
    %77 = math.tanh %76 : vector<32x256xf32>
    %c0_46 = arith.constant 0 : index
    %c0_47 = arith.constant 0 : index
    %78 = vector.load %arg14[%c0_46, %c0_47] : memref<32x1xf32, #tpu.memory_space<vmem>>, vector<32x1xf32>
    %79 = vector.broadcast %78 : vector<32x1xf32> to vector<32x256xf32>
    %80 = arith.mulf %79, %77 : vector<32x256xf32>
    %cst_48 = arith.constant dense<0.000000e+00> : vector<256xf32>
    %81 = vector.multi_reduction <add>, %80, %cst_48 [0] : vector<32x256xf32> to vector<256xf32>
    %82 = vector.shape_cast %81 : vector<256xf32> to vector<1x256xf32>
    %83 = vector.shape_cast %82 : vector<1x256xf32> to vector<1x1x256xf32>
    %c0_49 = arith.constant 0 : index
    %c0_50 = arith.constant 0 : index
    %c0_51 = arith.constant 0 : index
    %84 = vector.load %arg15[%c0_49, %c0_50, %c0_51] : memref<1x1x256xf32, #tpu.memory_space<vmem>>, vector<1x1x256xf32>
    tpu.vector_store %arg15[%c0_49, %c0_50, %c0_51], %83 {strides = array<i32>} : memref<1x1x256xf32, #tpu.memory_space<vmem>>, vector<1x1x256xf32>,
    return
  }
  func.func @transform_0(%arg0: i32) -> (i32, i32, i32) {
    %c0_i32 = arith.constant 0 : i32
    %c0_i32_0 = arith.constant 0 : i32
    %c0_i32_1 = arith.constant 0 : i32
    return %arg0, %c0_i32, %c0_i32_0 : i32, i32, i32
  }
  func.func @transform_1(%arg0: i32) -> (i32, i32, i32) {
    %c0_i32 = arith.constant 0 : i32
    %c0_i32_0 = arith.constant 0 : i32
    %c0_i32_1 = arith.constant 0 : i32
    return %arg0, %c0_i32, %c0_i32_0 : i32, i32, i32
  }
  func.func @transform_2(%arg0: i32) -> (i32, i32, i32) {
    %c0_i32 = arith.constant 0 : i32
    %c0_i32_0 = arith.constant 0 : i32
    %c0_i32_1 = arith.constant 0 : i32
    return %arg0, %c0_i32, %c0_i32_0 : i32, i32, i32
  }
  func.func @transform_3(%arg0: i32) -> (i32, i32) {
    %c0_i32 = arith.constant 0 : i32
    %c0_i32_0 = arith.constant 0 : i32
    %c0_i32_1 = arith.constant 0 : i32
    return %c0_i32, %c0_i32_0 : i32, i32
  }
  func.func @transform_4(%arg0: i32) -> (i32, i32) {
    %c0_i32 = arith.constant 0 : i32
    %c0_i32_0 = arith.constant 0 : i32
    %c0_i32_1 = arith.constant 0 : i32
    return %c0_i32, %c0_i32_0 : i32, i32
  }
  func.func @transform_5(%arg0: i32) -> (i32, i32) {
    %c0_i32 = arith.constant 0 : i32
    %c0_i32_0 = arith.constant 0 : i32
    %c0_i32_1 = arith.constant 0 : i32
    return %c0_i32, %c0_i32_0 : i32, i32
  }
  func.func @transform_6(%arg0: i32) -> (i32, i32) {
    %c0_i32 = arith.constant 0 : i32
    %c0_i32_0 = arith.constant 0 : i32
    %c0_i32_1 = arith.constant 0 : i32
    return %c0_i32, %c0_i32_0 : i32, i32
  }
  func.func @transform_7(%arg0: i32) -> (i32, i32) {
    %c0_i32 = arith.constant 0 : i32
    %c0_i32_0 = arith.constant 0 : i32
    %c0_i32_1 = arith.constant 0 : i32
    return %c0_i32, %c0_i32_0 : i32, i32
  }
  func.func @transform_8(%arg0: i32) -> (i32, i32) {
    %c0_i32 = arith.constant 0 : i32
    %c0_i32_0 = arith.constant 0 : i32
    %c0_i32_1 = arith.constant 0 : i32
    return %c0_i32, %c0_i32_0 : i32, i32
  }
  func.func @transform_9(%arg0: i32) -> (i32, i32) {
    %c0_i32 = arith.constant 0 : i32
    %c0_i32_0 = arith.constant 0 : i32
    %c0_i32_1 = arith.constant 0 : i32
    return %c0_i32, %c0_i32_0 : i32, i32
  }
  func.func @transform_10(%arg0: i32) -> (i32, i32) {
    %c0_i32 = arith.constant 0 : i32
    %c0_i32_0 = arith.constant 0 : i32
    %c0_i32_1 = arith.constant 0 : i32
    return %c0_i32, %c0_i32_0 : i32, i32
  }
  func.func @transform_11(%arg0: i32) -> (i32, i32) {
    %c0_i32 = arith.constant 0 : i32
    %c0_i32_0 = arith.constant 0 : i32
    %c0_i32_1 = arith.constant 0 : i32
    return %c0_i32, %c0_i32_0 : i32, i32
  }
  func.func @transform_12(%arg0: i32) -> (i32, i32) {
    %c0_i32 = arith.constant 0 : i32
    %c0_i32_0 = arith.constant 0 : i32
    %c0_i32_1 = arith.constant 0 : i32
    return %c0_i32, %c0_i32_0 : i32, i32
  }
  func.func @transform_13(%arg0: i32) -> (i32, i32) {
    %c0_i32 = arith.constant 0 : i32
    %c0_i32_0 = arith.constant 0 : i32
    %c0_i32_1 = arith.constant 0 : i32
    return %c0_i32, %c0_i32_0 : i32, i32
  }
  func.func @transform_14(%arg0: i32) -> (i32, i32, i32) {
    %c0_i32 = arith.constant 0 : i32
    %c0_i32_0 = arith.constant 0 : i32
    %c0_i32_1 = arith.constant 0 : i32
    return %arg0, %c0_i32, %c0_i32_0 : i32, i32, i32
  }
  func.func @transform_15(%arg0: i32) -> (i32, i32, i32) {
    %c0_i32 = arith.constant 0 : i32
    %c0_i32_0 = arith.constant 0 : i32
    %c0_i32_1 = arith.constant 0 : i32
    return %arg0, %c0_i32, %c0_i32_0 : i32, i32, i32
  }
}

</mosaic_0001>

<bundles_post_ra>
// kernel: tpu_custom_call.1
= control target key start
LH: loop header
LB: loop body
LE: loop exit
PB: predicated region body
PF: predicated region fallthrough
CT: control target
= control target key end

     0   :  { %21 = vsyncpa [#allocation3], 0  ;;  %s2499_s0 = inlined_call_operand.vmem [shape: bf16[1,32,256], index: 0, kind: input, shape index: {}]   ;;  %s2500_s1 = inlined_call_operand.vmem [shape: bf16[1,32,256], index: 1, kind: input, shape index: {}]   ;;  %s2501_s2 = inlined_call_operand.hbm [shape: f32[1,2,256], index: 2, kind: input, shape index: {}]   ;;  %s2502_s3 = inlined_call_operand.hbm [shape: f32[1,256], index: 3, kind: input, shape index: {}]   ;;  %s2503_s4 = inlined_call_operand.hbm [shape: bf16[2,256], index: 4, kind: input, shape index: {}]   ;;  %s2504_s5 = inlined_call_operand.hbm [shape: f32[256,512], index: 5, kind: input, shape index: {}]   ;;  %s2505_s6 = inlined_call_operand.hbm [shape: f32[1,512], index: 6, kind: input, shape index: {}]   ;;  %s2506_s7 = inlined_call_operand.hbm [shape: bf16[32,32], index: 7, kind: input, shape index: {}]   ;;  %s2507_s8 = inlined_call_operand.hbm [shape: bf16[32,32], index: 8, kind: input, shape index: {}]   ;;  %s2508_s9 = inlined_call_operand.vmem [shape: f32[32,128], index: 9, kind: input, shape index: {}]   ;;  %s2509_s10 = inlined_call_operand.vmem [shape: f32[32,1], index: 10, kind: input, shape index: {}]   ;;  %s2510_s11 = inlined_call_operand.hbm [shape: bf16[32,32], index: 11, kind: input, shape index: {}]   ;;  %s2511_s12 = inlined_call_operand.hbm [shape: f32[32,32], index: 12, kind: input, shape index: {}]   ;;  %s2512_s13 = inlined_call_operand.vmem [shape: f32[32,1], index: 13, kind: input, shape index: {}]   ;;  %s2513_s14 = inlined_call_operand.hbm [shape: f32[1,1,256], index: 14, kind: output, shape index: {0}]   ;;  %s2514_s15 = inlined_call_operand.hbm [shape: f32[1,2,128], index: 15, kind: output, shape index: {1}]  }
   0x1   :  { %22 = vsyncpa [#allocation6], 0 }
   0x2   :  { %23 = vsyncpa [#allocation9], 0 }
   0x3   :  { %24 = vsyncpa [#allocation12], 0 }
   0x4   :  { %25 = vsyncpa [#allocation15], 0 }
   0x5   :  { %26 = vsyncpa [#allocation4], 0 }
   0x6   :  { %27 = vsyncpa [#allocation19], 0  ;;  %s2081_s18 = smov [#allocation5]   ;;  %s2082_s20 = smov [#allocation8]  }
   0x7   :  { %s48_s19 = sshll.u32 %s2081_s18, 4  ;;  %s67_s21 = sshll.u32 %s2082_s20, 4  ;;  %s49_s19 = int_to_ptr.vmem [resolvable:$true] %s48_s19  ;;  %s2180_s21 = int_to_ptr.vmem [resolvable:$true] %s67_s21 }
   0x8   :  { %s1825_s24 = scalar_lea.hbm %s2502_s3, 32 }
   0x9   :  { %p1826_p0 = scmp.ne.s32.totalorder %s2502_s3, %s1825_s24  ;;  %p1829_p1 = scmp.lt.u32.totalorder %s1825_s24, %s2502_s3 }
   0xb   :  { %p1831_p2 = pnand %p1829_p1, %p1826_p0 }
   0xd   :  { %1834 = shalt.err (!%p1831_p2)
}
   0xe   :  { %s1835_s29 = scalar_lea.vmem %s49_s19, 32  ;;  %p1840_p4 = scmp.lt.s32.totalorder %s49_s19, %s49_s19 }
   0xf   :  { %p1836_p3 = scmp.ne.s32.totalorder %s49_s19, %s1835_s29  ;;  %p1841_p5 = scmp.lt.s32.totalorder %s1835_s29, %s1835_s29 }
  0x11   :  { %p1842_p6 = por %p1841_p5, %p1840_p4 }
  0x13   :  { %p1843_p7 = pnand %p1842_p6, %p1836_p3 }
  0x15   :  { %1846 = shalt.err (!%p1843_p7)
}
  0x16   :  { %51 = dma.hbm_to_vmem [thread:$0]  %s2502_s3, 32, %s49_s19, [#allocation6]  }
  0x17   :  { %s1847_s20 = scalar_lea.hbm %s2504_s5, 16384 }
  0x18   :  { %p1848_p8 = scmp.ne.s32.totalorder %s2504_s5, %s1847_s20  ;;  %p1851_p9 = scmp.lt.u32.totalorder %s1847_s20, %s2504_s5 }
  0x1a   :  { %p1853_p10 = pnand %p1851_p9, %p1848_p8 }
  0x1c   :  { %1856 = shalt.err (!%p1853_p10)
}
  0x1d   :  { %s1857_s26 = scalar_lea.vmem %s2180_s21, 16384  ;;  %p1862_p12 = scmp.lt.s32.totalorder %s2180_s21, %s2180_s21 }
  0x1e   :  { %p1858_p11 = scmp.ne.s32.totalorder %s2180_s21, %s1857_s26  ;;  %p1863_p13 = scmp.lt.s32.totalorder %s1857_s26, %s1857_s26 }
  0x20   :  { %p1864_p0 = por %p1863_p13, %p1862_p12 }
  0x22   :  { %p1865_p1 = pnand %p1864_p0, %p1858_p11 }
  0x24   :  { %1868 = shalt.err (!%p1865_p1)
}
  0x25   :  { %s2083_s3 = smov 512   ;;  %s2084_s19 = smov 32  }
  0x26   :  { %73 = dma.hbm_to_vmem [thread:$0]  %s2504_s5, 16384, %s2180_s21, [#allocation9], %s2083_s3, %s2083_s3, %s2084_s19  }
  0x27   :  { %s2085_s29 = smov [#allocation11]   ;;  %s1869_s18 = scalar_lea.hbm %s2506_s7, 256 }
  0x28   :  { %s89_s30 = sshll.u32 %s2085_s29, 4  ;;  %p1870_p2 = scmp.ne.s32.totalorder %s2506_s7, %s1869_s18  ;;  %s90_s30 = int_to_ptr.vmem [resolvable:$true] %s89_s30 }
  0x29   :  { %p1873_p3 = scmp.lt.u32.totalorder %s1869_s18, %s2506_s7 }
  0x2b   :  { %p1875_p4 = pnand %p1873_p3, %p1870_p2 }
  0x2d   :  { %1878 = shalt.err (!%p1875_p4)
}
  0x2e   :  { %s1879_s25 = scalar_lea.vmem %s90_s30, 256  ;;  %p1884_p6 = scmp.lt.s32.totalorder %s90_s30, %s90_s30 }
  0x2f   :  { %p1880_p5 = scmp.ne.s32.totalorder %s90_s30, %s1879_s25  ;;  %p1885_p7 = scmp.lt.s32.totalorder %s1879_s25, %s1879_s25 }
  0x31   :  { %p1886_p8 = por %p1885_p7, %p1884_p6 }
  0x33   :  { %p1887_p9 = pnand %p1886_p8, %p1880_p5 }
  0x35   :  { %1890 = shalt.err (!%p1887_p9)
}
  0x36   :  { %s2086_s5 = smov 64   ;;  %s2087_s21 = smov 4  }
  0x37   :  { %95 = dma.hbm_to_vmem [thread:$0]  %s2506_s7, 256, %s90_s30, [#allocation12], %s2086_s5, %s2086_s5, %s2087_s21  }
  0x38   :  { %s2088_s19 = smov [#allocation14]   ;;  %s2089_s28 = smov [#allocation2]  }
  0x39   :  { %s117_s27 = sshll.u32 %s2088_s19, 4  ;;  %s38_s29 = sshll.u32 %s2089_s28, 4  ;;  %s118_s27 = int_to_ptr.vmem [resolvable:$true] %s117_s27  ;;  %s39_s29 = int_to_ptr.vmem [resolvable:$true] %s38_s29 }
  0x3a   :  { %s1891_s18 = scalar_lea.hbm %s2510_s11, 256 }
  0x3b   :  { %p1892_p10 = scmp.ne.s32.totalorder %s2510_s11, %s1891_s18  ;;  %p1895_p11 = scmp.lt.u32.totalorder %s1891_s18, %s2510_s11 }
  0x3d   :  { %p1897_p12 = pnand %p1895_p11, %p1892_p10 }
  0x3f   :  { %1900 = shalt.err (!%p1897_p12)
}
  0x40   :  { %s1901_s7 = scalar_lea.vmem %s118_s27, 256  ;;  %p1906_p0 = scmp.lt.s32.totalorder %s118_s27, %s118_s27 }
  0x41   :  { %p1902_p13 = scmp.ne.s32.totalorder %s118_s27, %s1901_s7  ;;  %p1907_p1 = scmp.lt.s32.totalorder %s1901_s7, %s1901_s7 }
  0x43   :  { %p1908_p2 = por %p1907_p1, %p1906_p0 }
  0x45   :  { %p1909_p3 = pnand %p1908_p2, %p1902_p13 }
  0x47   :  { %1912 = shalt.err (!%p1909_p3)
}
  0x48   :  { %123 = dma.hbm_to_vmem [thread:$0]  %s2510_s11, 256, %s118_s27, [#allocation15], %s2086_s5, %s2086_s5, %s2087_s21  }
  0x49   :  { %s1913_s19 = scalar_lea.hbm %s2501_s2, 64 }
  0x4a   :  { %p1914_p4 = scmp.ne.s32.totalorder %s2501_s2, %s1913_s19  ;;  %p1917_p5 = scmp.lt.u32.totalorder %s1913_s19, %s2501_s2 }
  0x4c   :  { %p1919_p6 = pnand %p1917_p5, %p1914_p4 }
  0x4e   :  { %1922 = shalt.err (!%p1919_p6)
}
  0x4f   :  { %s1923_s20 = scalar_lea.vmem %s39_s29, 64  ;;  %p1928_p8 = scmp.lt.s32.totalorder %s39_s29, %s39_s29 }
  0x50   :  { %p1924_p7 = scmp.ne.s32.totalorder %s39_s29, %s1923_s20  ;;  %p1929_p9 = scmp.lt.s32.totalorder %s1923_s20, %s1923_s20 }
  0x52   :  { %p1930_p10 = por %p1929_p9, %p1928_p8 }
  0x54   :  { %p1931_p11 = pnand %p1930_p10, %p1924_p7 }
  0x56   :  { %1934 = shalt.err (!%p1931_p11)
}
  0x57   :  { %41 = dma.hbm_to_vmem [thread:$0]  %s2501_s2, 64, %s39_s29, [#allocation3]  }
  0x58   :  { %s2090_s22 = smov [#allocation7]   ;;  %s2091_s24 = smov [#allocation10]  }
  0x59   :  { %s58_s23 = sshll.u32 %s2090_s22, 4  ;;  %s80_s7 = sshll.u32 %s2091_s24, 4  ;;  %s59_s23 = int_to_ptr.vmem [resolvable:$true] %s58_s23  ;;  %s81_s7 = int_to_ptr.vmem [resolvable:$true] %s80_s7 }
  0x5a   :  { %s1935_s26 = scalar_lea.hbm %s2503_s4, 32 }
  0x5b   :  { %p1936_p12 = scmp.ne.s32.totalorder %s2503_s4, %s1935_s26  ;;  %p1939_p13 = scmp.lt.u32.totalorder %s1935_s26, %s2503_s4 }
  0x5d   :  { %p1941_p0 = pnand %p1939_p13, %p1936_p12 }
  0x5f   :  { %1944 = shalt.err (!%p1941_p0)
}
  0x60   :  { %s1945_s2 = scalar_lea.vmem %s59_s23, 32  ;;  %p1950_p2 = scmp.lt.s32.totalorder %s59_s23, %s59_s23 }
  0x61   :  { %p1946_p1 = scmp.ne.s32.totalorder %s59_s23, %s1945_s2  ;;  %p1951_p3 = scmp.lt.s32.totalorder %s1945_s2, %s1945_s2 }
  0x63   :  { %p1952_p4 = por %p1951_p3, %p1950_p2 }
  0x65   :  { %p1953_p5 = pnand %p1952_p4, %p1946_p1 }
  0x67   :  { %1956 = shalt.err (!%p1953_p5)
}
  0x68   :  { %61 = dma.hbm_to_vmem [thread:$0]  %s2503_s4, 32, %s59_s23, [#allocation6]  }
  0x69   :  { %s1957_s11 = scalar_lea.hbm %s2505_s6, 64 }
  0x6a   :  { %p1958_p6 = scmp.ne.s32.totalorder %s2505_s6, %s1957_s11  ;;  %p1961_p7 = scmp.lt.u32.totalorder %s1957_s11, %s2505_s6 }
  0x6c   :  { %p1963_p8 = pnand %p1961_p7, %p1958_p6 }
  0x6e   :  { %1966 = shalt.err (!%p1963_p8)
}
  0x6f   :  { %s1967_s25 = scalar_lea.vmem %s81_s7, 64  ;;  %p1972_p10 = scmp.lt.s32.totalorder %s81_s7, %s81_s7 }
  0x70   :  { %p1968_p9 = scmp.ne.s32.totalorder %s81_s7, %s1967_s25  ;;  %p1973_p11 = scmp.lt.s32.totalorder %s1967_s25, %s1967_s25 }
  0x72   :  { %p1974_p12 = por %p1973_p11, %p1972_p10 }
  0x74   :  { %p1975_p13 = pnand %p1974_p12, %p1968_p9 }
  0x76   :  { %1978 = shalt.err (!%p1975_p13)
}
  0x77   :  { %83 = dma.hbm_to_vmem [thread:$0]  %s2505_s6, 64, %s81_s7, [#allocation9]  }
  0x78   :  { %s2092_s26 = smov [#allocation13]   ;;  %s2093_s19 = smov [#allocation16]  }
  0x79   :  { %s101_s3 = sshll.u32 %s2092_s26, 4  ;;  %s129_s28 = sshll.u32 %s2093_s19, 4  ;;  %s102_s3 = int_to_ptr.vmem [resolvable:$true] %s101_s3  ;;  %s130_s28 = int_to_ptr.vmem [resolvable:$true] %s129_s28 }
  0x7a   :  { %s1979_s29 = scalar_lea.hbm %s2507_s8, 256 }
  0x7b   :  { %p1980_p0 = scmp.ne.s32.totalorder %s2507_s8, %s1979_s29  ;;  %p1983_p1 = scmp.lt.u32.totalorder %s1979_s29, %s2507_s8 }
  0x7d   :  { %p1985_p2 = pnand %p1983_p1, %p1980_p0 }
  0x7f   :  { %1988 = shalt.err (!%p1985_p2)
}
  0x80   :  { %s1989_s6 = scalar_lea.vmem %s102_s3, 256  ;;  %p1994_p4 = scmp.lt.s32.totalorder %s102_s3, %s102_s3 }
  0x81   :  { %p1990_p3 = scmp.ne.s32.totalorder %s102_s3, %s1989_s6  ;;  %p1995_p5 = scmp.lt.s32.totalorder %s1989_s6, %s1989_s6 }
  0x83   :  { %p1996_p6 = por %p1995_p5, %p1994_p4 }
  0x85   :  { %p1997_p7 = pnand %p1996_p6, %p1990_p3 }
  0x87   :  { %2000 = shalt.err (!%p1997_p7)
}
  0x88   :  { %107 = dma.hbm_to_vmem [thread:$0]  %s2507_s8, 256, %s102_s3, [#allocation12], %s2086_s5, %s2086_s5, %s2087_s21  }
  0x89   :  { %s2001_s30 = scalar_lea.hbm %s2511_s12, 512 }
  0x8a   :  { %p2002_p8 = scmp.ne.s32.totalorder %s2511_s12, %s2001_s30  ;;  %p2005_p9 = scmp.lt.u32.totalorder %s2001_s30, %s2511_s12 }
  0x8c   :  { %p2007_p10 = pnand %p2005_p9, %p2002_p8 }
  0x8e   :  { %2010 = shalt.err (!%p2007_p10)
}
  0x8f   :  { %s2011_s19 = scalar_lea.vmem %s130_s28, 512  ;;  %p2016_p12 = scmp.lt.s32.totalorder %s130_s28, %s130_s28 }
  0x90   :  { %p2012_p11 = scmp.ne.s32.totalorder %s130_s28, %s2011_s19  ;;  %p2017_p13 = scmp.lt.s32.totalorder %s2011_s19, %s2011_s19 }
  0x92   :  { %p2018_p0 = por %p2017_p13, %p2016_p12 }
  0x94   :  { %p2019_p1 = pnand %p2018_p0, %p2012_p11 }
  0x96   :  { %2022 = shalt.err (!%p2019_p1)
}
  0x97   :  { %s2094_s8 = smov 128   ;;  %s2095_s5 = smov 8  }
  0x98   :  { %135 = dma.hbm_to_vmem [thread:$0]  %s2511_s12, 512, %s130_s28, [#allocation15], %s2094_s8, %s2094_s8, %s2095_s5  }
  0x99   :  { %2067 = dma.done.wait [#allocation3], 64  }
  0x9a   :  { %2068 = vsyncadd [#allocation3], 4294967232 }
  0x9b   :  { %2069 = dma.done.wait [#allocation6], 64  }
  0x9c   :  { %2070 = vsyncadd [#allocation6], 4294967232 }
  0x9d   :  { %2071 = dma.done.wait [#allocation9], 16448  }
  0x9e   :  { %2072 = vsyncadd [#allocation9], 4294950848 }
  0x9f   :  { %2073 = dma.done.wait [#allocation12], 512  }
  0xa0   :  { %2074 = vsyncadd [#allocation12], 4294966784 }
  0xa1   :  { %2075 = dma.done.wait [#allocation15], 768  }
  0xa2   :  { %2076 = vsyncadd [#allocation15], 4294966528  ;;  %v170_v0 = vld [vmem:[#allocation8 + $0x8] sm:$0xff]  ;;  %v169_v2 = vld [vmem:[#allocation8] sm:$0xff]  ;;  %vm627_vm0 = vcmask 261120   ;;  %vm808_vm1 = vcmask 1040384  }
  0xa3   :  { %v174_v1 = vld [vmem:[#allocation8 + $0x28] sm:$0xff]  ;;  %v173_v4 = vld [vmem:[#allocation8 + $0x20] sm:$0xff]  ;;  %v172_v21 = vld [vmem:[#allocation8 + $0x18] sm:$0xff]  ;;  %vm801_vm2 = vcmask 15360  }
  0xa4   :  { %v1578_v3 = vpack.c.bf16 %v174_v1, %v170_v0  ;;  %v178_v5 = vld [vmem:[#allocation8 + $0x48] sm:$0xff]  ;;  %v1580_v7 = vpack.c.bf16 %v173_v4, %v169_v2  ;;  %v177_v9 = vld [vmem:[#allocation8 + $0x40] sm:$0xff]  ;;  %v176_v25 = vld [vmem:[#allocation8 + $0x38] sm:$0xff] }
  0xa5   :  { %v182_v6 = vld [vmem:[#allocation8 + $0x68] sm:$0xff]  ;;  %v181_v10 = vld [vmem:[#allocation8 + $0x60] sm:$0xff]  ;;  %v1642_v27 = vpack.c.bf16 %v176_v25, %v172_v21  ;;  %v171_v28 = vld [vmem:[#allocation8 + $0x10] sm:$0xff] }
  0xa6   :  { %v1582_v8 = vpack.c.bf16 %v182_v6, %v178_v5  ;;  %v186_v11 = vld [vmem:[#allocation8 + $0x88] sm:$0xff]  ;;  %1579 = vmatprep.subr.bf16.mxu0 %v1578_v3  ;;  %v1584_v13 = vpack.c.bf16 %v181_v10, %v177_v9  ;;  %v185_v15 = vld [vmem:[#allocation8 + $0x80] sm:$0xff]  ;;  %v175_v29 = vld [vmem:[#allocation8 + $0x30] sm:$0xff] }
  0xa7   :  { %v190_v12 = vld [vmem:[#allocation8 + $0xa8] sm:$0xff]  ;;  %1581 = vmatpush1.bf16.msra.mxu0 %v1580_v7  ;;  %v189_v16 = vld [vmem:[#allocation8 + $0xa0] sm:$0xff]  ;;  %v1644_v30 = vpack.c.bf16 %v175_v29, %v171_v28  ;;  %v180_v31 = vld [vmem:[#allocation8 + $0x58] sm:$0xff]  ;;  %1643 = vmatprep.subr.bf16.mxu1 %v1642_v27 }
  0xa8   :  { %1583 = vmatprep.subr.bf16.mxu0 %v1582_v8  ;;  %v1586_v14 = vpack.c.bf16 %v190_v12, %v186_v11  ;;  %v194_v17 = vld [vmem:[#allocation8 + $0xc8] sm:$0xff]  ;;  %v1588_v19 = vpack.c.bf16 %v189_v16, %v185_v15  ;;  %v193_v20 = vld [vmem:[#allocation8 + $0xc0] sm:$0xff]  ;;  %v184_v32 = vld [vmem:[#allocation8 + $0x78] sm:$0xff] }
  0xa9   :  { %v198_v18 = vld [vmem:[#allocation8 + $0xe8] sm:$0xff]  ;;  %v197_v23 = vld [vmem:[#allocation8 + $0xe0] sm:$0xff]  ;;  %v1646_v35 = vpack.c.bf16 %v184_v32, %v180_v31  ;;  %v179_v36 = vld [vmem:[#allocation8 + $0x50] sm:$0xff]  ;;  %1645 = vmatpush1.bf16.msra.mxu1 %v1644_v30 }
  0xaa   :  { %v1590_v22 = vpack.c.bf16 %v198_v18, %v194_v17  ;;  %v202_v24 = vld [vmem:[#allocation8 + $0x108] sm:$0xff]  ;;  %v1592_v33 = vpack.c.bf16 %v197_v23, %v193_v20  ;;  %v201_v34 = vld [vmem:[#allocation8 + $0x100] sm:$0xff]  ;;  %v183_v40 = vld [vmem:[#allocation8 + $0x70] sm:$0xff] }
  0xab   :  { %1585 = vmatpush1.bf16.msra.mxu0 %v1584_v13  ;;  %v206_v26 = vld [vmem:[#allocation8 + $0x128] sm:$0xff]  ;;  %v205_v38 = vld [vmem:[#allocation8 + $0x120] sm:$0xff]  ;;  %1647 = vmatprep.subr.bf16.mxu1 %v1646_v35  ;;  %v1648_v42 = vpack.c.bf16 %v183_v40, %v179_v36  ;;  %v188_v43 = vld [vmem:[#allocation8 + $0x98] sm:$0xff] }
  0xac   :  { %1587 = vmatprep.subr.bf16.mxu0 %v1586_v14  ;;  %v1594_v37 = vpack.c.bf16 %v206_v26, %v202_v24  ;;  %v210_v39 = vld [vmem:[#allocation8 + $0x148] sm:$0xff]  ;;  %v192_v44 = vld [vmem:[#allocation8 + $0xb8] sm:$0xff]  ;;  %v187_v46 = vld [vmem:[#allocation8 + $0x90] sm:$0xff]  ;;  %v1596_v48 = vpack.c.bf16 %v205_v38, %v201_v34 }
  0xad   :  { %v214_v41 = vld [vmem:[#allocation8 + $0x168] sm:$0xff]  ;;  %v1650_v45 = vpack.c.bf16 %v192_v44, %v188_v43  ;;  %v191_v47 = vld [vmem:[#allocation8 + $0xb0] sm:$0xff]  ;;  %v209_v49 = vld [vmem:[#allocation8 + $0x140] sm:$0xff]  ;;  %1649 = vmatpush1.bf16.msra.mxu1 %v1648_v42 }
  0xae   :  { %v196_v50 = vld [vmem:[#allocation8 + $0xd8] sm:$0xff]  ;;  %v1598_v51 = vpack.c.bf16 %v214_v41, %v210_v39  ;;  %v213_v52 = vld [vmem:[#allocation8 + $0x160] sm:$0xff]  ;;  %v218_v53 = vld [vmem:[#allocation8 + $0x188] sm:$0xff]  ;;  %v1652_v54 = vpack.c.bf16 %v191_v47, %v187_v46 }
  0xaf   :  { %1589 = vmatpush1.bf16.msra.mxu0 %v1588_v19  ;;  %v200_v55 = vld [vmem:[#allocation8 + $0xf8] sm:$0xff]  ;;  %v222_v56 = vld [vmem:[#allocation8 + $0x1a8] sm:$0xff]  ;;  %1651 = vmatprep.subr.bf16.mxu1 %v1650_v45  ;;  %v195_v58 = vld [vmem:[#allocation8 + $0xd0] sm:$0xff]  ;;  %v1600_v62 = vpack.c.bf16 %v213_v52, %v209_v49 }
  0xb0   :  { %1591 = vmatprep.subr.bf16.mxu0 %v1590_v22  ;;  %v1654_v57 = vpack.c.bf16 %v200_v55, %v196_v50  ;;  %v199_v59 = vld [vmem:[#allocation8 + $0xf0] sm:$0xff]  ;;  %v204_v60 = vld [vmem:[#allocation8 + $0x118] sm:$0xff]  ;;  %v1602_v63 = vpack.c.bf16 %v222_v56, %v218_v53  ;;  %v217_v0 = vld [vmem:[#allocation8 + $0x180] sm:$0xff] }
  0xb1   :  { %v208_v61 = vld [vmem:[#allocation8 + $0x138] sm:$0xff]  ;;  %v221_v1 = vld [vmem:[#allocation8 + $0x1a0] sm:$0xff]  ;;  %v226_v2 = vld [vmem:[#allocation8 + $0x1c8] sm:$0xff]  ;;  %1653 = vmatpush1.bf16.msra.mxu1 %v1652_v54  ;;  %v1656_v3 = vpack.c.bf16 %v199_v59, %v195_v58 }
  0xb2   :  { %v230_v4 = vld [vmem:[#allocation8 + $0x1e8] sm:$0xff]  ;;  %1655 = vmatprep.subr.bf16.mxu1 %v1654_v57  ;;  %v1658_v5 = vpack.c.bf16 %v208_v61, %v204_v60  ;;  %v203_v6 = vld [vmem:[#allocation8 + $0x110] sm:$0xff]  ;;  %v212_v8 = vld [vmem:[#allocation8 + $0x158] sm:$0xff]  ;;  %v1604_v10 = vpack.c.bf16 %v221_v1, %v217_v0 }
  0xb3   :  { %1593 = vmatpush1.bf16.msra.mxu0 %v1592_v33  ;;  %v207_v7 = vld [vmem:[#allocation8 + $0x130] sm:$0xff]  ;;  %v216_v9 = vld [vmem:[#allocation8 + $0x178] sm:$0xff]  ;;  %v1606_v11 = vpack.c.bf16 %v230_v4, %v226_v2  ;;  %v225_v12 = vld [vmem:[#allocation8 + $0x1c0] sm:$0xff] }
  0xb4   :  { %1595 = vmatprep.subr.bf16.mxu0 %v1594_v37  ;;  %v229_v13 = vld [vmem:[#allocation8 + $0x1e0] sm:$0xff]  ;;  %v234_v14 = vld [vmem:[#allocation8 + $0x208] sm:$0xff]  ;;  %v1660_v15 = vpack.c.bf16 %v207_v7, %v203_v6  ;;  %v1662_v17 = vpack.c.bf16 %v216_v9, %v212_v8  ;;  %v211_v18 = vld [vmem:[#allocation8 + $0x150] sm:$0xff] }
  0xb5   :  { %1657 = vmatpush1.bf16.msra.mxu1 %v1656_v3  ;;  %v238_v16 = vld [vmem:[#allocation8 + $0x228] sm:$0xff]  ;;  %v215_v19 = vld [vmem:[#allocation8 + $0x170] sm:$0xff]  ;;  %v220_v20 = vld [vmem:[#allocation8 + $0x198] sm:$0xff]  ;;  %v1608_v22 = vpack.c.bf16 %v229_v13, %v225_v12 }
  0xb6   :  { %1659 = vmatprep.subr.bf16.mxu1 %v1658_v5  ;;  %v224_v21 = vld [vmem:[#allocation8 + $0x1b8] sm:$0xff]  ;;  %v1610_v23 = vpack.c.bf16 %v238_v16, %v234_v14  ;;  %v233_v24 = vld [vmem:[#allocation8 + $0x200] sm:$0xff]  ;;  %v242_v26 = vld [vmem:[#allocation8 + $0x248] sm:$0xff]  ;;  %v1664_v27 = vpack.c.bf16 %v215_v19, %v211_v18 }
  0xb7   :  { %1597 = vmatpush1.bf16.msra.mxu0 %v1596_v48  ;;  %v237_v25 = vld [vmem:[#allocation8 + $0x220] sm:$0xff]  ;;  %v246_v28 = vld [vmem:[#allocation8 + $0x268] sm:$0xff]  ;;  %v1666_v29 = vpack.c.bf16 %v224_v21, %v220_v20  ;;  %v219_v30 = vld [vmem:[#allocation8 + $0x190] sm:$0xff] }
  0xb8   :  { %1599 = vmatprep.subr.bf16.mxu0 %v1598_v51  ;;  %v223_v31 = vld [vmem:[#allocation8 + $0x1b0] sm:$0xff]  ;;  %v228_v32 = vld [vmem:[#allocation8 + $0x1d8] sm:$0xff]  ;;  %v1612_v34 = vpack.c.bf16 %v237_v25, %v233_v24  ;;  %v241_v35 = vld [vmem:[#allocation8 + $0x240] sm:$0xff]  ;;  %v1614_v36 = vpack.c.bf16 %v246_v28, %v242_v26 }
  0xb9   :  { %1661 = vmatpush1.bf16.msra.mxu1 %v1660_v15  ;;  %v232_v33 = vld [vmem:[#allocation8 + $0x1f8] sm:$0xff]  ;;  %v245_v37 = vld [vmem:[#allocation8 + $0x260] sm:$0xff]  ;;  %v250_v38 = vld [vmem:[#allocation8 + $0x288] sm:$0xff]  ;;  %v1668_v40 = vpack.c.bf16 %v223_v31, %v219_v30 }
  0xba   :  { %1663 = vmatprep.subr.bf16.mxu1 %v1662_v17  ;;  %v254_v39 = vld [vmem:[#allocation8 + $0x2a8] sm:$0xff]  ;;  %v1670_v41 = vpack.c.bf16 %v232_v33, %v228_v32  ;;  %v227_v42 = vld [vmem:[#allocation8 + $0x1d0] sm:$0xff]  ;;  %v2304_v44 = vld.sshfl [vmem:[#allocation2] sm:$0x33 pattern:$0x76325410]  ;;  %v1616_v48 = vpack.c.bf16 %v245_v37, %v241_v35 }
  0xbb   :  { %1601 = vmatpush1.bf16.msra.mxu0 %v1600_v62  ;;  %v231_v43 = vld [vmem:[#allocation8 + $0x1f0] sm:$0xff]  ;;  %v236_v45 = vld [vmem:[#allocation8 + $0x218] sm:$0xff]  ;;  %v2308_v47 = vcombine.high %v2304_v44, %v2304_v44  ;;  %v1618_v49 = vpack.c.bf16 %v254_v39, %v250_v38  ;;  %v249_v50 = vld [vmem:[#allocation8 + $0x280] sm:$0xff] }
  0xbc   :  { %1603 = vmatprep.subr.bf16.mxu0 %v1602_v63  ;;  %v240_v46 = vld [vmem:[#allocation8 + $0x238] sm:$0xff]  ;;  %v253_v51 = vld [vmem:[#allocation8 + $0x2a0] sm:$0xff]  ;;  %v258_v52 = vld [vmem:[#allocation8 + $0x2c8] sm:$0xff]  ;;  %v1672_v53 = vpack.c.bf16 %v231_v43, %v227_v42 }
  0xbd   :  { %1665 = vmatpush1.bf16.msra.mxu1 %v1664_v27  ;;  %v262_v54 = vld [vmem:[#allocation8 + $0x2e8] sm:$0xff]  ;;  %v1674_v55 = vpack.c.bf16 %v240_v46, %v236_v45  ;;  %v235_v56 = vld [vmem:[#allocation8 + $0x210] sm:$0xff]  ;;  %394 = vmatprep.mubr.f32.mxu0 %v2308_v47  ;;  %v244_v58 = vld [vmem:[#allocation8 + $0x258] sm:$0xff]  ;;  %v1620_v60 = vpack.c.bf16 %v253_v51, %v249_v50 }
  0xbe   :  { %1667 = vmatprep.subr.bf16.mxu1 %v1666_v29  ;;  %v239_v57 = vld [vmem:[#allocation8 + $0x230] sm:$0xff]  ;;  %v248_v59 = vld [vmem:[#allocation8 + $0x278] sm:$0xff]  ;;  %465 = vmatprep.mubr.f32.mxu1 %v2308_v47  ;;  %v257_v61 = vld [vmem:[#allocation8 + $0x2c0] sm:$0xff]  ;;  %v1622_v62 = vpack.c.bf16 %v262_v54, %v258_v52 }
  0xbf   :  { %1605 = vmatpush1.bf16.msra.mxu0 %v1604_v10  ;;  %v261_v63 = vld [vmem:[#allocation8 + $0x2e0] sm:$0xff]  ;;  %v266_v0 = vld [vmem:[#allocation8 + $0x308] sm:$0xff]  ;;  %v1676_v2 = vpack.c.bf16 %v239_v57, %v235_v56  ;;  %v1678_v3 = vpack.c.bf16 %v248_v59, %v244_v58  ;;  %v243_v4 = vld [vmem:[#allocation8 + $0x250] sm:$0xff] }
  0xc0   :  { %1607 = vmatprep.subr.bf16.mxu0 %v1606_v11  ;;  %v270_v1 = vld [vmem:[#allocation8 + $0x328] sm:$0xff]  ;;  %v247_v5 = vld [vmem:[#allocation8 + $0x270] sm:$0xff]  ;;  %v252_v6 = vld [vmem:[#allocation8 + $0x298] sm:$0xff]  ;;  %v1624_v10 = vpack.c.bf16 %v261_v63, %v257_v61 }
  0xc1   :  { %1669 = vmatpush1.bf16.msra.mxu1 %v1668_v40  ;;  %v265_v7 = vld [vmem:[#allocation8 + $0x300] sm:$0xff]  ;;  %v256_v9 = vld [vmem:[#allocation8 + $0x2b8] sm:$0xff]  ;;  %v274_v11 = vld [vmem:[#allocation8 + $0x348] sm:$0xff]  ;;  %v1626_v15 = vpack.c.bf16 %v270_v1, %v266_v0  ;;  %v1680_v16 = vpack.c.bf16 %v247_v5, %v243_v4  ;;  %v2096_v4 = vmov 1966171168  }
  0xc2   :  { %1671 = vmatprep.subr.bf16.mxu1 %v1670_v41  ;;  %v269_v8 = vld [vmem:[#allocation8 + $0x320] sm:$0xff]  ;;  %v278_v12 = vld [vmem:[#allocation8 + $0x368] sm:$0xff]  ;;  %v251_v13 = vld [vmem:[#allocation8 + $0x290] sm:$0xff]  ;;  %v1682_v19 = vpack.c.bf16 %v256_v9, %v252_v6  ;;  %v780_v5 = vunpack.c.l.s4 %v2096_v4 }
  0xc3   :  { %1609 = vmatpush1.bf16.msra.mxu0 %v1608_v22  ;;  %v255_v14 = vld [vmem:[#allocation8 + $0x2b0] sm:$0xff]  ;;  %v260_v17 = vld [vmem:[#allocation8 + $0x2d8] sm:$0xff]  ;;  %v273_v20 = vld [vmem:[#allocation8 + $0x340] sm:$0xff]  ;;  %v1628_v22 = vpack.c.bf16 %v269_v8, %v265_v7  ;;  %v1630_v24 = vpack.c.bf16 %v278_v12, %v274_v11  ;;  %v299_v7 = vlaneseq }
  0xc4   :  { %1611 = vmatprep.subr.bf16.mxu0 %v1610_v23  ;;  %v264_v18 = vld [vmem:[#allocation8 + $0x2f8] sm:$0xff]  ;;  %v277_v21 = vld [vmem:[#allocation8 + $0x360] sm:$0xff]  ;;  %v282_v23 = vld [vmem:[#allocation8 + $0x388] sm:$0xff]  ;;  %v1684_v25 = vpack.c.bf16 %v255_v14, %v251_v13  ;;  %v781_v8 = vunpack.c.0.s8 %v780_v5  ;;  %v2097_v13 = vmov 0  }
  0xc5   :  { %1673 = vmatpush1.bf16.msra.mxu1 %v1672_v53  ;;  %v286_v26 = vld [vmem:[#allocation8 + $0x3a8] sm:$0xff]  ;;  %v1686_v27 = vpack.c.bf16 %v264_v18, %v260_v17  ;;  %v259_v28 = vld [vmem:[#allocation8 + $0x2d0] sm:$0xff]  ;;  %v268_v30 = vld [vmem:[#allocation8 + $0x318] sm:$0xff]  ;;  %v1632_v32 = vpack.c.bf16 %v277_v21, %v273_v20  ;;  %v2318_v9 = vshrl.u32 %v299_v7, 7  ;;  %1758 = vset.pattern.permute.xlu1 %v2097_v13 }
  0xc6   :  { %1675 = vmatprep.subr.bf16.mxu1 %v1674_v55  ;;  %v263_v29 = vld [vmem:[#allocation8 + $0x2f0] sm:$0xff]  ;;  %v272_v31 = vld [vmem:[#allocation8 + $0x338] sm:$0xff]  ;;  %v1634_v33 = vpack.c.bf16 %v286_v26, %v282_v23  ;;  %v285_v35 = vld [vmem:[#allocation8 + $0x3a0] sm:$0xff]  ;;  %1757 = vset.pattern.permute.xlu0 %v2097_v13 }
  0xc7   :  { %1613 = vmatpush1.bf16.msra.mxu0 %v1612_v34  ;;  %v281_v34 = vld [vmem:[#allocation8 + $0x380] sm:$0xff]  ;;  %v1688_v37 = vpack.c.bf16 %v263_v29, %v259_v28  ;;  %v294_v38 = vld [vmem:[#allocation8 + $0x3e8] sm:$0xff]  ;;  %v1690_v39 = vpack.c.bf16 %v272_v31, %v268_v30  ;;  %v267_v40 = vld [vmem:[#allocation8 + $0x310] sm:$0xff]  ;;  %v2327_v11 = vsub.s32 %v781_v8, %v2318_v9  ;;  %v2385_v29 = vsub.s32 0, %v2318_v9 }
  0xc8   :  { %1615 = vmatprep.subr.bf16.mxu0 %v1614_v36  ;;  %v290_v36 = vld [vmem:[#allocation8 + $0x3c8] sm:$0xff]  ;;  %v271_v41 = vld [vmem:[#allocation8 + $0x330] sm:$0xff]  ;;  %v276_v42 = vld [vmem:[#allocation8 + $0x358] sm:$0xff]  ;;  %v1636_v45 = vpack.c.bf16 %v285_v35, %v281_v34  ;;  %v305_v31 = vsub.s32 1, %v2318_v9 }
  0xc9   :  { %1677 = vmatpush1.bf16.msra.mxu1 %v1676_v2  ;;  %v280_v43 = vld [vmem:[#allocation8 + $0x378] sm:$0xff]  ;;  %v1638_v46 = vpack.c.bf16 %v294_v38, %v290_v36  ;;  %v1692_v50 = vpack.c.bf16 %v271_v41, %v267_v40  ;;  %v275_v52 = vld [vmem:[#allocation8 + $0x350] sm:$0xff]  ;;  %v1773_v26 = vld [vmem:[#allocation11] sm:$0xff]  }
  0xca   :  { %1679 = vmatprep.subr.bf16.mxu1 %v1678_v3  ;;  %v1694_v51 = vpack.c.bf16 %v280_v43, %v276_v42  ;;  %v279_v53 = vld [vmem:[#allocation8 + $0x370] sm:$0xff]  ;;  %v284_v54 = vld [vmem:[#allocation8 + $0x398] sm:$0xff]  ;;  %v297_v30 = vld [vmem:[#allocation10] sm:$0xf] }
  0xcb   :  { %1617 = vmatpush1.bf16.msra.mxu0 %v1616_v48  ;;  %v289_v48 = vld [vmem:[#allocation8 + $0x3c0] sm:$0xff]  ;;  %v288_v55 = vld [vmem:[#allocation8 + $0x3b8] sm:$0xff]  ;;  %v1696_v57 = vpack.c.bf16 %v279_v53, %v275_v52  ;;  %v283_v59 = vld [vmem:[#allocation8 + $0x390] sm:$0xff]  ;;  %v306_v34 = vrot.slane %v297_v30, %v305_v31 }
  0xcc   :  { %1619 = vmatprep.subr.bf16.mxu0 %v1618_v49  ;;  %v293_v49 = vld [vmem:[#allocation8 + $0x3e0] sm:$0xff]  ;;  %v1698_v58 = vpack.c.bf16 %v288_v55, %v284_v54  ;;  %v292_v61 = vld [vmem:[#allocation8 + $0x3d8] sm:$0xff]  ;;  %v291_v1 = vld [vmem:[#allocation8 + $0x3d0] sm:$0xff] }
  0xcd   :  { %1681 = vmatpush1.bf16.msra.mxu1 %v1680_v16  ;;  %v1640_v56 = vpack.c.bf16 %v293_v49, %v289_v48  ;;  %v295_v2 = vld [vmem:[#allocation8 + $0x3f0] sm:$0xff]  ;;  %v500_v6 = vld [vmem:[%s2508_s9] sm:$0xff]  ;;  %v885_v4 = vld [vmem:[%s2509_s10 + $0x8] sm:$0xff] }
  0xce   :  { %1683 = vmatprep.subr.bf16.mxu1 %v1682_v19  ;;  %v1704_v3 = vpack.c.bf16 %v295_v2, %v291_v1  ;;  %v1764_v12 = vld [vmem:[%s2500_s1 + $0x14] ss:$8 sps:$4 sm:$0xff]   ;;  %v1762_v14 = vld [vmem:[%s2500_s1 + $0x10] ss:$8 sps:$4 sm:$0xff]   ;;  %v2342_v16 = vld [vmem:[#allocation7] sm:$0x3] }
  0xcf   :  { %1621 = vmatpush1.bf16.msra.mxu0 %v1620_v60  ;;  %v287_v60 = vld [vmem:[#allocation8 + $0x3b0] sm:$0xff]  ;;  %v785_v17 = vrot.slane %v2342_v16, %v2327_v11  ;;  %v2350_v19 = vld [vmem:[%s2499_s0] ss:$8 sps:$4 sm:$0xff]   ;;  %v886_v1 = vld [vmem:[%s2509_s10 + $0x10] sm:$0xff] }
  0xd0   :  { %1623 = vmatprep.subr.bf16.mxu0 %v1622_v62  ;;  %v296_v62 = vld [vmem:[#allocation8 + $0x3f8] sm:$0xff]  ;;  %v1700_v63 = vpack.c.bf16 %v287_v60, %v283_v59  ;;  %v2356_v20 = vld [vmem:[%s2499_s0 + $0x14] ss:$8 sps:$4 sm:$0xff]   ;;  %900 = vperm.xlu1 %1758, %v886_v1  }
  0xd1   :  { %1685 = vmatpush1.bf16.msra.mxu1 %v1684_v25  ;;  %v1702_v0 = vpack.c.bf16 %v296_v62, %v292_v61  ;;  %v1765_v18 = vld [vmem:[#allocation13] sm:$0xff]   ;;  %v786_v21 = vcombine.high %v785_v17, %v785_v17  ;;  %v793_v25 = vrot.slane %v785_v17, %v2327_v11  ;;  %v1774_v28 = vld [vmem:[#allocation11 + $0x8] sm:$0xff]  }
  0xd2   :  { %1687 = vmatprep.subr.bf16.mxu1 %v1686_v27  ;;  %v884_v2 = vld [vmem:[%s2509_s10] sm:$0xff]  ;;  %v1404_v8 = vld [vmem:[%s2512_s13 + $0x10] sm:$0xff] }
  0xd3   :  { %1625 = vmatpush1.bf16.msra.mxu0 %v1624_v10  ;;  %v1759_v10 = vld [vmem:[%s2500_s1] ss:$8 sps:$4 sm:$0xff]   ;;  %v2368_v23 = vrot.slane %v786_v21, %v2327_v11  ;;  %v2377_v27 = vsel %vm808_vm1, %v793_v25, 0  ;;  %890 = vperm.xlu0 %1757, %v884_v2  }
  0xd4   :  { %1627 = vmatprep.subr.bf16.mxu0 %v1626_v15  ;;  %v2340_v15 = vld [vmem:[%s2499_s0 + $0x4] ss:$8 sps:$4 sm:$0xff]  }
  0xd5   :  { %1689 = vmatpush1.bf16.msra.mxu1 %v1688_v37  ;;  %v1402_v5 = vld [vmem:[%s2512_s13] sm:$0xff] }
  0xd6   :  { %1691 = vmatprep.subr.bf16.mxu1 %v1690_v39 }
  0xd7   :  { %1629 = vmatpush1.bf16.msra.mxu0 %v1628_v22  ;;  %v2364_v22 = vld [vmem:[%s2499_s0 + $0x10] ss:$8 sps:$4 sm:$0xff]   ;;  %895 = vperm.xlu0 %1757, %v885_v4  }
  0xd8   :  { %1631 = vmatprep.subr.bf16.mxu0 %v1630_v24  ;;  %v1766_v24 = vld [vmem:[#allocation13 + $0x8] sm:$0xff]  }
  0xd9   :  { %1693 = vmatpush1.bf16.msra.mxu1 %v1692_v50 }
  0xda   :  { %1695 = vmatprep.subr.bf16.mxu1 %v1694_v51 }
  0xdb   :  { %1633 = vmatpush1.bf16.msra.mxu0 %v1632_v32  ;;  %v302_v32 = vrot.slane %v297_v30, %v2385_v29 }
  0xdc   :  { %1635 = vmatprep.subr.bf16.mxu0 %v1634_v33 }
  0xdd   :  { %1697 = vmatpush1.bf16.msra.mxu1 %v1696_v57 }
  0xde   :  { %1699 = vmatprep.subr.bf16.mxu1 %v1698_v58 }
  0xdf   :  { %1637 = vmatpush1.bf16.msra.mxu0 %v1636_v45  ;;  %v313_v45 = vsub.s32 3, %v2318_v9 }
  0xe0   :  { %1639 = vmatprep.subr.bf16.mxu0 %v1638_v46  ;;  %v309_v46 = vsub.s32 2, %v2318_v9 }
  0xe1   :  { %1701 = vmatpush1.bf16.msra.mxu1 %v1700_v63  ;;  %v314_v48 = vrot.slane %v297_v30, %v313_v45  ;;  %v501_v63 = vld [vmem:[%s2508_s9 + $0x8] sm:$0xff] }
  0xe2   :  { %1703 = vmatprep.subr.bf16.mxu1 %v1702_v0  ;;  %v310_v51 = vrot.slane %v297_v30, %v309_v46  ;;  %v502_v0 = vld [vmem:[%s2508_s9 + $0x10] sm:$0xff] }
  0xe3   :  { %1641 = vmatpush1.bf16.msra.mxu0 %v1640_v56 }
  0xe5   :  { %1705 = vmatpush1.bf16.msra.mxu1 %v1704_v3  ;;  %v887_v3 = vld [vmem:[%s2509_s10 + $0x18] sm:$0xff]  ;;  %s2098_s10 = smov [#allocation18]  }
  0xe6   :  { %395 = vmatmul.mubr.f32.vlgmr.msra.gmra.mrb[0].mxu0 %v2304_v44  ;;  %905 = vperm.xlu1 %1758, %v887_v3   ;;  %v167_v3 = vld [vmem:[#allocation5] sm:$0x3] }
  0xe7   :  { %1558 = vmatprep.mubr.f32.mxu0 %v500_v6  ;;  %v1403_v6 = vld [vmem:[%s2512_s13 + $0x8] sm:$0xff] }
  0xe8   :  { %466 = vmatmul.mubr.f32.vlgmr.msra.gmra.mrb[0].mxu1 %v2304_v44  ;;  %v1761_v44 = vld [vmem:[%s2500_s1 + $0x4] ss:$8 sps:$4 sm:$0xff]  }
  0xe9   :  { %634 = vmatprep.subr.bf16.mxu1 %v1761_v44  ;;  %666 = vmatprep.mubr.bf16.mxu1 %v2097_v13 }
  0xea   :  { %635 = vmatpush1.bf16.msra.mxu1 %v1759_v10  ;;  %1408 = vperm.xlu1 %1758, %v1402_v5   ;;  %v1405_v10 = vld [vmem:[%s2512_s13 + $0x18] sm:$0xff]  ;;  %s1491_s13 = sshll.u32 %s2098_s10, 4  ;;  %s1492_s13 = int_to_ptr.vmem [resolvable:$true] %s1491_s13 }
  0xeb   :  { %636 = vmatprep.subr.bf16.mxu1 %v1764_v12  ;;  %s2023_s1 = scalar_lea.vmem %s1492_s13, 32  ;;  %p2028_p3 = scmp.lt.s32.totalorder %s1492_s13, %s1492_s13 }
  0xec   :  { %p2024_p2 = scmp.ne.s32.totalorder %s1492_s13, %s2023_s1  ;;  %p2029_p4 = scmp.lt.s32.totalorder %s2023_s1, %s2023_s1 }
  0xee   :  { %637 = vmatpush1.bf16.msra.mxu1 %v1762_v14  ;;  %1413 = vperm.xlu1 %1758, %v1403_v6   ;;  %p2030_p5 = por %p2029_p4, %p2028_p3 }
  0xef   :  { %723 = vmatprep.subr.bf16.mxu1 %v2340_v15 }
  0xf0   :  { %p2031_p6 = pnand %p2030_p5, %p2024_p2 }
  0xf1   :  { %1517 = vmatmul.mubr.msk.bf16.vlgmr.msra.gmra.mrb[4].mxu1 %vm627_vm0, %v1765_v18 }
  0xf2   :  { %676 = vmatprep.mubr.bf16.mxu1 %v2097_v13  ;;  %724 = vmatpush1.bf16.msra.mxu1 %v2350_v19 }
  0xf3   :  { %725 = vmatprep.subr.bf16.mxu1 %v2356_v20  ;;  %1418 = vperm.xlu1 %1758, %v1404_v8  }
  0xf6   :  { %726 = vmatpush1.bf16.msra.mxu1 %v2364_v22 }
  0xf7   :  { %1527 = vmatprep.subr.msk.bf16.mxu1 %vm808_vm1, %v2368_v23  ;;  %1423 = vperm.xlu1 %1758, %v1405_v10   ;;  %v938_v10 = vrot.slane %v167_v3, %v2385_v29 }
  0xf9   :  { %1518 = vmatmul.mubr.msk.bf16.gmra.mrb[8].mxu1 %vm627_vm0, %v1766_v24 }
  0xfa   :  { %755 = vmatprep.mubr.bf16.mxu1 %v2097_v13 }
 0x101   :  { %1525 = vmatmul.mubr.msk.bf16.vlgmr.msra.gmra.mrb[4].mxu1 %vm627_vm0, %v1773_v26 }
 0x102   :  { %765 = vmatprep.mubr.bf16.mxu1 %v2097_v13  ;;  %816 = vmatpush1.bf16.msra.mxu1 %v2377_v27 }
 0x109   :  { %1526 = vmatmul.mubr.msk.bf16.gmra.mrb[8].mxu1 %vm627_vm0, %v1774_v28 }
 0x10a   :  { %847 = vmatprep.mubr.bf16.mxu1 %v2097_v13 }
 0x152   :  { %v891_v30 = vpop.permute.xlu0 %890 }
 0x1b9   :  { %v396_v33 = vpop.f32.mrb[0].mxu0 }
 0x1ba   :  { %v397_v35 = vadd.f32 %v396_v33, %v302_v32  ;;  %v398_v36 = vpop.f32.mrb[1].mxu0 }
 0x1bb   :  { %v399_v38 = vadd.f32 %v398_v36, %v306_v34  ;;  %v467_v40 = vpop.f32.mrb[0].mxu1 }
 0x1bc   :  { %v1509_v37 = vmul.f32 -1.442695, %v397_v35  ;;  %v469_v41 = vpop.f32.mrb[1].mxu1  ;;  %v468_v54 = vadd.f32 %v467_v40, %v310_v51 }
 0x1bd   :  { %v1510_v39 = vmul.f32 -1.442695, %v399_v38  ;;  %v470_v52 = vadd.f32 %v469_v41, %v314_v48 }
 0x1be   :  { %1777 = vpow2.f32 %v1509_v37  ;;  %v896_v37 = vpop.permute.xlu0 %895 }
 0x1bf   :  { %1779 = vpow2.f32 %v1510_v39 }
 0x1c8   :  { %v1778_v42 = vpop.eup %1777 }
 0x1c9   :  { %v475_v43 = vadd.f32 1.0, %v1778_v42  ;;  %v1780_v49 = vpop.eup %1779 }
 0x1ca   :  { %v481_v50 = vadd.f32 1.0, %v1780_v49 }
 0x1cb   :  { %1781 = vrcp.f32 %v475_v43  ;;  %v901_v43 = vpop.permute.xlu1 %900 }
 0x1cc   :  { %1783 = vrcp.f32 %v481_v50 }
 0x1d5   :  { %v1782_v53 = vpop.eup %1781 }
 0x1d6   :  { %v484_v55 = vmul.f32 %v1782_v53, %v470_v52  ;;  %v1784_v57 = vpop.eup %1783 }
 0x1d7   :  { %v487_v58 = vsub.f32 1.0, %v1784_v57  ;;  %v489_v61 = vmul.f32 %v1784_v57, %v2308_v47  ;;  %v503_v47 = vld [vmem:[%s2508_s9 + $0x18] sm:$0xff] }
 0x1d8   :  { %v485_v56 = vadd.f32 %v484_v55, %v468_v54  ;;  %v906_v54 = vpop.permute.xlu1 %905 }
 0x1da   :  { %1785 = vtanh.f32 %v485_v56 }
 0x1e4   :  { %v1786_v59 = vpop.eup %1785 }
 0x1e5   :  { %v488_v60 = vmul.f32 %v1786_v59, %v487_v58 }
 0x1e7   :  { %v490_v62 = vadd.f32 %v489_v61, %v488_v60 }
 0x1e9   :  { %1556 = vmatprep.subr.mxu0 %v490_v62  ;;  %491 = vst [vmem:[#allocation18] sm:$0x3] %v490_v62 }
 0x1ea   :  { %1557 = vmatpush3.xpose.msra.mxu0 %v490_v62 }
 0x1eb   :  { %962 = vmatprep.subr.bf16.mxu0 %v2368_v23 }
 0x1ed   :  { %1559 = vmatmul.mubr.f32.vlgmr.msra.gmra.mrb[2].mxu0 %v501_v63 }
 0x1ee   :  { %1561 = vmatprep.mubr.f32.mxu0 %v502_v0  ;;  %963 = vmatpush1.bf16.xpose.msra.mxu0 %v793_v25 }
 0x1ef   :  { %1530 = vmatprep.subr.msk.bf16.mxu0 %vm808_vm1, %v2368_v23 }
 0x1f1   :  { %1562 = vmatmul.mubr.f32.gmra.mrb[4].mxu0 %v503_v47 }
 0x2c0   :  { %v1560_v44 = vpop.f32.mrb[2].mxu0 }
 0x2c1   :  { %v570_v12 = vpop.f32.mrb[3].mxu0 }
 0x2c2   :  { %v776_v14 = vpack.c.bf16 %v1560_v44, %v570_v12  ;;  %v942_v12 = vrot.slane %v167_v3, %v305_v31 }
 0x2c4   :  { %1528 = vmatmul.mubr.msk.bf16.vlgmr.msra.gmra.mrb[4].mxu1 %vm801_vm2, %v776_v14  ;;  %v1563_v17 = vpop.f32.mrb[4].mxu0 }
 0x2c5   :  { %v580_v18 = vpop.f32.mrb[5].mxu0  ;;  %857 = vmatprep.mubr.bf16.mxu1 %v2097_v13 }
 0x2c6   :  { %v777_v21 = vpack.c.bf16 %v1563_v17, %v580_v18 }
 0x2cc   :  { %1529 = vmatmul.mubr.msk.bf16.gmra.mrb[8].mxu1 %vm801_vm2, %v777_v21 }
 0x2cd   :  { %1142 = vmatprep.mubr.bf16.mxu1 %v2340_v15 }
 0x397   :  { %v849_v24 = vpop.f32.mrb[4].mxu1 }
 0x398   :  { %1787 = vtanh.f32 %v849_v24  ;;  %v851_v25 = vpop.f32.mrb[5].mxu1 }
 0x399   :  { %1789 = vtanh.f32 %v851_v25  ;;  %v853_v26 = vpop.f32.mrb[6].mxu1 }
 0x39a   :  { %1791 = vtanh.f32 %v853_v26  ;;  %v855_v28 = vpop.f32.mrb[7].mxu1 }
 0x39b   :  { %1793 = vtanh.f32 %v855_v28 }
 0x39f   :  { %v859_v32 = vpop.f32.mrb[8].mxu1 }
 0x3a0   :  { %1795 = vtanh.f32 %v859_v32  ;;  %v861_v33 = vpop.f32.mrb[9].mxu1 }
 0x3a1   :  { %1797 = vtanh.f32 %v861_v33  ;;  %v863_v34 = vpop.f32.mrb[10].mxu1 }
 0x3a2   :  { %v1788_v35 = vpop.eup %1787  ;;  %1799 = vtanh.f32 %v863_v34  ;;  %v865_v36 = vpop.f32.mrb[11].mxu1 }
 0x3a3   :  { %v1790_v38 = vpop.eup %1789  ;;  %1801 = vtanh.f32 %v865_v36  ;;  %v908_v41 = vmul.f32 %v1788_v35, %v891_v30 }
 0x3a4   :  { %v1792_v39 = vpop.eup %1791  ;;  %v909_v45 = vmul.f32 %v1790_v38, %v891_v30 }
 0x3a5   :  { %v1794_v40 = vpop.eup %1793  ;;  %v910_v42 = vmul.f32 %v1792_v39, %v896_v37 }
 0x3a6   :  { %v911_v46 = vmul.f32 %v1794_v40, %v896_v37 }
 0x3a7   :  { %v916_v48 = vadd.f32 %v910_v42, %v908_v41 }
 0x3a8   :  { %v925_v49 = vadd.f32 %v911_v46, %v909_v45 }
 0x3aa   :  { %v1796_v50 = vpop.eup %1795 }
 0x3ab   :  { %v1798_v51 = vpop.eup %1797  ;;  %v912_v52 = vmul.f32 %v1796_v50, %v901_v43 }
 0x3ac   :  { %v1800_v53 = vpop.eup %1799  ;;  %v913_v55 = vmul.f32 %v1798_v51, %v901_v43 }
 0x3ad   :  { %v1802_v56 = vpop.eup %1801  ;;  %v914_v57 = vmul.f32 %v1800_v53, %v906_v54  ;;  %v917_v58 = vadd.f32 %v916_v48, %v912_v52 }
 0x3ae   :  { %v915_v59 = vmul.f32 %v1802_v56, %v906_v54  ;;  %v926_v60 = vadd.f32 %v925_v49, %v913_v55 }
 0x3af   :  { %v918_v61 = vadd.f32 %v917_v58, %v914_v57 }
 0x3b0   :  { %v927_v62 = vadd.f32 %v926_v60, %v915_v59 }
 0x3b1   :  { %v919_v63 = vrot.slane %v918_v61, 4 }
 0x3b2   :  { %v928_v0 = vrot.slane %v927_v62, 4 }
 0x3b3   :  { %v920_v47 = vadd.f32 %v919_v63, %v918_v61 }
 0x3b4   :  { %v929_v1 = vadd.f32 %v928_v0, %v927_v62 }
 0x3b5   :  { %v921_v2 = vrot.slane %v920_v47, 2 }
 0x3b6   :  { %v930_v4 = vrot.slane %v929_v1, 2 }
 0x3b7   :  { %v922_v5 = vadd.f32 %v921_v2, %v920_v47 }
 0x3b8   :  { %v931_v6 = vadd.f32 %v930_v4, %v929_v1 }
 0x3b9   :  { %v923_v8 = vrot.slane %v922_v5, 1 }
 0x3ba   :  { %v932_v44 = vrot.slane %v931_v6, 1 }
 0x3bb   :  { %v924_v14 = vadd.f32 %v923_v8, %v922_v5 }
 0x3bc   :  { %v933_v17 = vadd.f32 %v932_v44, %v931_v6  ;;  %v1160_v44 = vld [vmem:[#allocation16 + $0x8] sm:$0xff] }
 0x3bd   :  { %v945_v18 = vadd.f32 %v938_v10, %v924_v14  ;;  %v1162_v14 = vld [vmem:[#allocation16 + $0x18] sm:$0xff] }
 0x3be   :  { %v946_v21 = vadd.f32 %v942_v12, %v933_v17  ;;  %v1161_v12 = vld [vmem:[#allocation16 + $0x10] sm:$0xff] }
 0x3bf   :  { %v947_v24 = vsel %vm808_vm1, %v945_v18, -inf }
 0x3c0   :  { %v948_v25 = vsel %vm808_vm1, %v946_v21, -inf }
 0x3c1   :  { %v949_v26 = vmax.f32 %v947_v24, %v948_v25 }
 0x3c3   :  { %950 = vmax.xlane.f32.xlu0 %v949_v26 }
 0x450   :  { %v951_v28 = vpop.xlane.xlu0 %950 }
 0x451   :  { %v952_v30 = vsub.f32 %v945_v18, %v951_v28  ;;  %v953_v32 = vsub.f32 %v946_v21, %v951_v28 }
 0x453   :  { %v954_v33 = vmul.f32 1.442695, %v952_v30  ;;  %v956_v34 = vmul.f32 1.442695, %v953_v32 }
 0x455   :  { %1803 = vpow2.f32 %v954_v33 }
 0x456   :  { %1805 = vpow2.f32 %v956_v34 }
 0x45f   :  { %v1804_v35 = vpop.eup %1803 }
 0x460   :  { %v1806_v9 = vpop.eup %1805  ;;  %v958_v31 = vpack.c.bf16 %v1804_v35, %v1804_v35 }
 0x461   :  { %v959_v36 = vpack.c.bf16 %v1806_v9, %v1806_v9 }
 0x463   :  { %994 = vmatprep.mubr.bf16.mxu0 %v959_v36 }
 0x464   :  { %995 = vmatmul.mubr.bf16.vlgmr.msra.gmra.mrb[8].mxu0 %v958_v31 }
 0x465   :  { %1008 = vmatpush1.bf16.msra.mxu0 %v2377_v27  ;;  %1039 = vmatprep.mubr.bf16.mxu0 %v2097_v13 }
 0x537   :  { %v996_v37 = vpop.f32.mrb[8].mxu0 }
 0x538   :  { %1807 = vrcp.f32 %v996_v37  ;;  %v998_v38 = vpop.f32.mrb[9].mxu0 }
 0x539   :  { %v999_v39 = vpop.f32.mrb[10].mxu0 }
 0x53a   :  { %v1000_v40 = vpop.f32.mrb[11].mxu0 }
 0x542   :  { %v1808_v41 = vpop.eup %1807 }
 0x543   :  { %v1003_v42 = vpack.c.bf16 %v1808_v41, %v1808_v41 }
 0x545   :  { %1531 = vmatmul.mubr.msk.bf16.vlgmr.msra.gmra.mrb[12].mxu0 %vm801_vm2, %v1003_v42 }
 0x618   :  { %v1041_v43 = vpop.f32.mrb[12].mxu0 }
 0x619   :  { %v1048_v45 = vmul.f32 %v1804_v35, %v1041_v43  ;;  %v1043_v46 = vpop.f32.mrb[13].mxu0 }
 0x61a   :  { %v1049_v48 = vmul.f32 %v1806_v9, %v1043_v46  ;;  %v1045_v49 = vpop.f32.mrb[14].mxu0 }
 0x61b   :  { %v1050_v50 = vpack.c.bf16 %v1048_v45, %v1048_v45  ;;  %v1046_v51 = vpop.f32.mrb[15].mxu0 }
 0x61c   :  { %v1051_v52 = vpack.c.bf16 %v1049_v48, %v1049_v48 }
 0x61d   :  { %v1053_v53 = vpack.i.b16 %v1050_v50, %v1050_v50 }
 0x61e   :  { %v1060_v54 = vpack.i.b16 %v1051_v52, %v1051_v52 }
 0x61f   :  { %v1058_v55 = vrot.slane %v1053_v53, %v2385_v29 }
 0x620   :  { %v1065_v56 = vrot.slane %v1060_v54, %v2385_v29  ;;  %v1159_v29 = vld [vmem:[#allocation16] sm:$0xff] }
 0x621   :  { %1572 = vmatprep.mubr.msk.f32.mxu0 %vm627_vm0, %v1159_v29 }
 0x622   :  { %v1068_v57 = vcombine.low %v1058_v55, %v1065_v56 }
 0x624   :  { %v1075_v58 = vrot.slane %v1068_v57, %v2327_v11 }
 0x626   :  { %v1082_v59 = vrot.slane %v1075_v58, %v2327_v11 }
 0x628   :  { %v1084_v60 = vmul.bf16 %v1082_v59, %v2342_v16 }
 0x62a   :  { %v1092_v61 = vrot.slane %v1084_v60, %v2327_v11 }
 0x62c   :  { %v1093_v62 = vcombine.high %v1092_v61, %v1092_v61  ;;  %v1100_v0 = vrot.slane %v1092_v61, %v2327_v11 }
 0x62e   :  { %v1107_v63 = vrot.slane %v1093_v62, %v2327_v11 }
 0x630   :  { %1110 = vmatprep.subr.bf16.mxu1 %v1107_v63 }
 0x631   :  { %1111 = vmatpush1.bf16.xpose.msra.mxu1 %v1100_v0 }
 0x638   :  { %1143 = vmatmul.mubr.bf16.vlgmr.msra.gmra.mrb[12].mxu1 %v2350_v19 }
 0x639   :  { %1150 = vmatprep.mubr.bf16.mxu1 %v2356_v20 }
 0x640   :  { %1151 = vmatmul.mubr.bf16.gmra.mrb[16].mxu1 %v2364_v22 }
 0x70b   :  { %v1144_v47 = vpop.f32.mrb[12].mxu1 }
 0x70c   :  { %v1146_v16 = vpop.f32.mrb[13].mxu1 }
 0x70d   :  { %v1147_v1 = vpop.f32.mrb[14].mxu1 }
 0x70e   :  { %v1706_v2 = vpack.c.bf16 %v1147_v1, %v1144_v47  ;;  %v1149_v3 = vpop.f32.mrb[15].mxu1 }
 0x710   :  { %1707 = vmatprep.subr.bf16.mxu0 %v1706_v2 }
 0x711   :  { %1709 = vmatpush3.bf16.msra.mxu0 %v1706_v2 }
 0x713   :  { %v1152_v4 = vpop.f32.mrb[16].mxu1 }
 0x714   :  { %v1154_v5 = vpop.f32.mrb[17].mxu1 }
 0x715   :  { %v1155_v6 = vpop.f32.mrb[18].mxu1 }
 0x716   :  { %v1710_v8 = vpack.c.bf16 %v1155_v6, %v1152_v4  ;;  %v1157_v10 = vpop.f32.mrb[19].mxu1 }
 0x718   :  { %1711 = vmatprep.subr.bf16.mxu0 %v1710_v8 }
 0x719   :  { %1713 = vmatpush3.bf16.msra.mxu0 %v1710_v8 }
 0x71a   :  { %1536 = vmatprep.subr.msk.bf16.mxu0 %vm808_vm1, %v2368_v23 }
 0x71c   :  { %1573 = vmatmul.mubr.msk.f32.vlgmr.msra.gmra.mrb[6].mxu0 %vm627_vm0, %v1160_v44 }
 0x71d   :  { %1575 = vmatprep.mubr.msk.f32.mxu0 %vm627_vm0, %v1161_v12  ;;  %1273 = vmatpush1.bf16.msra.mxu0 %v2377_v27  ;;  %v1776_v27 = vld [vmem:[#allocation14 + $0x8] sm:$0xff]  }
 0x71e   :  { %1341 = vmatprep.subr.bf16.mxu0 %v2340_v15  ;;  %v1775_v15 = vld [vmem:[#allocation14] sm:$0xff]  }
 0x720   :  { %1576 = vmatmul.mubr.msk.f32.gmra.mrb[16].mxu0 %vm627_vm0, %v1162_v14 }
 0x721   :  { %1304 = vmatprep.mubr.bf16.mxu0 %v2097_v13 }
 0x7ef   :  { %v1574_v17 = vpop.f32.mrb[6].mxu0 }
 0x7f0   :  { %v1241_v18 = vpop.f32.mrb[7].mxu0 }
 0x7f1   :  { %v1264_v21 = vpack.c.bf16 %v1574_v17, %v1241_v18 }
 0x7f3   :  { %1537 = vmatmul.mubr.msk.bf16.vlgmr.msra.gmra.mrb[20].mxu0 %vm801_vm2, %v1264_v21  ;;  %v1577_v24 = vpop.f32.mrb[16].mxu0 }
 0x7f4   :  { %v1251_v23 = vpop.f32.mrb[17].mxu0  ;;  %1314 = vmatprep.mubr.bf16.mxu0 %v2097_v13  ;;  %1342 = vmatpush1.bf16.msra.mxu0 %v2350_v19 }
 0x7f5   :  { %v1265_v25 = vpack.c.bf16 %v1577_v24, %v1251_v23  ;;  %1343 = vmatprep.subr.bf16.mxu0 %v2356_v20 }
 0x7f8   :  { %1344 = vmatpush1.bf16.msra.mxu0 %v2364_v22 }
 0x7fb   :  { %1538 = vmatmul.mubr.msk.bf16.gmra.mrb[24].mxu0 %vm801_vm2, %v1265_v25 }
 0x7fc   :  { %1373 = vmatprep.mubr.bf16.mxu0 %v2097_v13 }
 0x803   :  { %1541 = vmatmul.mubr.msk.bf16.vlgmr.msra.gmra.mrb[20].mxu0 %vm627_vm0, %v1775_v15 }
 0x804   :  { %1383 = vmatprep.mubr.bf16.mxu0 %v2097_v13 }
 0x80b   :  { %1542 = vmatmul.mubr.msk.bf16.gmra.mrb[24].mxu0 %vm627_vm0, %v1776_v27 }
 0x80c   :  { %2034 = shalt.err (!%p2031_p6)
}
 0x80d   :  { %s2035_s25 = scalar_lea.hbm %s2514_s15, 32 }
 0x80e   :  { %p2036_p7 = scmp.ne.s32.totalorder %s2514_s15, %s2035_s25  ;;  %p2039_p8 = scmp.lt.u32.totalorder %s2035_s25, %s2514_s15 }
 0x810   :  { %p2041_p9 = pnand %p2039_p8, %p2036_p7 }
 0x812   :  { %2044 = shalt.err (!%p2041_p9)
}
 0x813   :  { %1494 = dma.vmem_to_hbm [thread:$0]  %s1492_s13, 32, %s2514_s15, [#allocation19]   ;;  %v1409_v22 = vpop.permute.xlu1 %1408  ;;  %vm1472_vm3 = vcmp.lt.s32.totalorder %v299_v7, 256 }
 0x814   :  { %s2099_s15 = smov [#allocation17]  }
 0x815   :  { %s1481_s5 = sshll.u32 %s2099_s15, 4  ;;  %s1482_s5 = int_to_ptr.vmem [resolvable:$true] %s1481_s5 }
 0x816   :  { %s2045_s21 = scalar_lea.vmem %s1482_s5, 32  ;;  %p2050_p11 = scmp.lt.s32.totalorder %s1482_s5, %s1482_s5 }
 0x817   :  { %v1414_v30 = vpop.permute.xlu1 %1413  ;;  %p2046_p10 = scmp.ne.s32.totalorder %s1482_s5, %s2045_s21  ;;  %p2051_p12 = scmp.lt.s32.totalorder %s2045_s21, %s2045_s21 }
 0x819   :  { %p2052_p13 = por %p2051_p12, %p2050_p11 }
 0x81b   :  { %v1419_v39 = vpop.permute.xlu1 %1418  ;;  %p2053_p0 = pnand %p2052_p13, %p2046_p10 }
 0x81f   :  { %v1424_v50 = vpop.permute.xlu1 %1423 }
 0x8d6   :  { %v1375_v13 = vpop.f32.mrb[20].mxu0 }
 0x8d7   :  { %1809 = vtanh.f32 %v1375_v13  ;;  %v1377_v19 = vpop.f32.mrb[21].mxu0 }
 0x8d8   :  { %1811 = vtanh.f32 %v1377_v19  ;;  %v1379_v20 = vpop.f32.mrb[22].mxu0 }
 0x8d9   :  { %1813 = vtanh.f32 %v1379_v20  ;;  %v1381_v26 = vpop.f32.mrb[23].mxu0 }
 0x8da   :  { %1815 = vtanh.f32 %v1381_v26 }
 0x8de   :  { %v1385_v28 = vpop.f32.mrb[24].mxu0 }
 0x8df   :  { %1817 = vtanh.f32 %v1385_v28  ;;  %v1387_v32 = vpop.f32.mrb[25].mxu0 }
 0x8e0   :  { %1819 = vtanh.f32 %v1387_v32  ;;  %v1389_v33 = vpop.f32.mrb[26].mxu0 }
 0x8e1   :  { %v1810_v34 = vpop.eup %1809  ;;  %1821 = vtanh.f32 %v1389_v33  ;;  %v1391_v35 = vpop.f32.mrb[27].mxu0 }
 0x8e2   :  { %v1812_v9 = vpop.eup %1811  ;;  %1823 = vtanh.f32 %v1391_v35  ;;  %v1426_v37 = vmul.f32 %v1810_v34, %v1409_v22 }
 0x8e3   :  { %v1814_v31 = vpop.eup %1813  ;;  %v1427_v40 = vmul.f32 %v1812_v9, %v1409_v22 }
 0x8e4   :  { %v1816_v36 = vpop.eup %1815  ;;  %v1428_v38 = vmul.f32 %v1814_v31, %v1414_v30 }
 0x8e5   :  { %v1429_v41 = vmul.f32 %v1816_v36, %v1414_v30 }
 0x8e6   :  { %v1434_v42 = vadd.f32 %v1428_v38, %v1426_v37 }
 0x8e7   :  { %v1443_v43 = vadd.f32 %v1429_v41, %v1427_v40 }
 0x8e9   :  { %v1818_v45 = vpop.eup %1817 }
 0x8ea   :  { %v1820_v46 = vpop.eup %1819  ;;  %v1430_v48 = vmul.f32 %v1818_v45, %v1419_v39 }
 0x8eb   :  { %v1822_v49 = vpop.eup %1821  ;;  %v1431_v51 = vmul.f32 %v1820_v46, %v1419_v39 }
 0x8ec   :  { %v1824_v52 = vpop.eup %1823  ;;  %v1435_v53 = vadd.f32 %v1434_v42, %v1430_v48  ;;  %v1432_v54 = vmul.f32 %v1822_v49, %v1424_v50 }
 0x8ed   :  { %v1444_v55 = vadd.f32 %v1443_v43, %v1431_v51  ;;  %v1433_v56 = vmul.f32 %v1824_v52, %v1424_v50 }
 0x8ee   :  { %v1436_v57 = vadd.f32 %v1435_v53, %v1432_v54 }
 0x8ef   :  { %v1445_v58 = vadd.f32 %v1444_v55, %v1433_v56 }
 0x8f0   :  { %v1437_v59 = vrot.slane %v1436_v57, 4 }
 0x8f1   :  { %v1446_v60 = vrot.slane %v1445_v58, 4 }
 0x8f2   :  { %v1438_v61 = vadd.f32 %v1437_v59, %v1436_v57 }
 0x8f3   :  { %v1447_v62 = vadd.f32 %v1446_v60, %v1445_v58 }
 0x8f4   :  { %v1439_v63 = vrot.slane %v1438_v61, 2 }
 0x8f5   :  { %v1448_v0 = vrot.slane %v1447_v62, 2 }
 0x8f6   :  { %v1440_v29 = vadd.f32 %v1439_v63, %v1438_v61 }
 0x8f7   :  { %v1449_v47 = vadd.f32 %v1448_v0, %v1447_v62 }
 0x8f8   :  { %v1441_v16 = vrot.slane %v1440_v29, 1 }
 0x8f9   :  { %v1450_v1 = vrot.slane %v1449_v47, 1 }
 0x8fa   :  { %v1442_v2 = vadd.f32 %v1441_v16, %v1440_v29 }
 0x8fb   :  { %v1451_v3 = vadd.f32 %v1450_v1, %v1449_v47 }
 0x8fd   :  { %v1454_v4 = vcombine.low %v1442_v2, %v1451_v3 }
 0x8ff   :  { %v1461_v5 = vrot.slane %v1454_v4, %v2327_v11 }
 0x901   :  { %v1468_v6 = vrot.slane %v1461_v5, %v2327_v11 }
 0x903   :  { %1474 = vst.msk [vmem:[#allocation17] sm:$0x3] %vm1472_vm3, %v1468_v6 }
 0x904   :  { %2056 = shalt.err (!%p2053_p0)
}
 0x905   :  { %s2057_s28 = scalar_lea.hbm %s2513_s14, 32 }
 0x906   :  { %p2058_p1 = scmp.ne.s32.totalorder %s2513_s14, %s2057_s28  ;;  %p2061_p2 = scmp.lt.u32.totalorder %s2057_s28, %s2513_s14 }
 0x908   :  { %p2063_p3 = pnand %p2061_p2, %p2058_p1 }
 0x90a   :  { %2066 = shalt.err (!%p2063_p3)
}
 0x90b   :  { %1484 = dma.vmem_to_hbm [thread:$0]  %s1482_s5, 32, %s2513_s14, [#allocation4]  }
 0x90c   :  { %2077 = dma.done.wait [#allocation4], 32  }
 0x90d   :  { %2078 = vsyncadd [#allocation4], 4294967264 }
 0x90e   :  { %2079 = dma.done.wait [#allocation19], 32  }
 0x90f   :  { %2080 = vsyncadd [#allocation19], 4294967264 }
 0x910   :  { %1501 = vsyncpa [#allocation3], 1 }
 0x911   :  { %1502 = vsyncpa [#allocation6], 1 }
 0x912   :  { %1503 = vsyncpa [#allocation9], 1 }
 0x913   :  { %1504 = vsyncpa [#allocation12], 1 }
 0x914   :  { %1505 = vsyncpa [#allocation15], 1 }
 0x915   :  { %1506 = vsyncpa [#allocation4], 1 }
 0x916   :  { %1507 = vsyncpa [#allocation19], 1 }

</bundles_post_ra>
